<compile_context>
chip_gen: v7x
topology: tpu7x:2x2x1
jax: 0.10.0
libtpu: 0.0.40
codegen_flags: <defaults>
</compile_context>

<pallas_src>
import functools
from collections import namedtuple

import numpy as np
import jax
import jax.numpy as jnp
from jax.experimental import pallas as pl
from jax.experimental.pallas import tpu as pltpu

DepthEstimatorOutputs = namedtuple(
    "DepthEstimatorOutputs",
    ["captimgs", "captimgs_linear", "est_images", "est_depthmaps",
     "target_images", "target_depthmaps", "psf"])


def _round_up(x, m):
    return ((x + m - 1) // m) * m


# 3x3 bilinear demosaic kernels (Debayer3x3), RGGB pattern.
_G_KERNEL = ((0.0, 0.25, 0.0), (0.25, 1.0, 0.25), (0.0, 0.25, 0.0))
_RB_KERNEL = ((0.25, 0.5, 0.25), (0.5, 1.0, 0.5), (0.25, 0.5, 0.25))
_DEBAYER_KERNELS = (_RB_KERNEL, _G_KERNEL, _RB_KERNEL)        # R, G, B


def _shift_cols(x, s):
    """shifted[:, c] = x[:, c + s] (circular).

    Wrapped lanes only ever land in columns that are masked out downstream
    (see the asserts in fused_camera_pass).  jnp.roll with a static shift
    lowers to a lane rotate/select on Mosaic (same work class as pltpu.roll,
    which would be the single-XLU-op drop-in on hardware) and is portable to
    interpret mode."""
    if s == 0:
        return x
    return jnp.roll(x, shift=-s, axis=1)


# ----------------------------------------------------------------------------
# Fused camera kernel (one grid step per batch element):
#   sRGB -> linear -> per-channel separable KxK PSF blur -> RGGB Bayer mosaic
#   -> + Gaussian read noise -> bilinear 3x3 demosaic restricted to the
#   2*crop_width-cropped region -> clamp -> linear -> sRGB.
# ----------------------------------------------------------------------------
def _fused_camera_kernel(x_ref, noise_ref, o_ref, *, H, W, K, cw, Hout, Wout,
                         taps):
    # x_ref     : (1, 3, H + 2p + 2, WP) zero-padded sRGB image,
    #             image pixel (h, w) lives at x_ref[0, c, h + p + 1, w + p].
    # noise_ref : (1, H + 2, WP) sigma-scaled N(0,1) read noise (Bayer plane).
    # o_ref     : (1, 3, Hout, Wout) est_images (sRGB), exact width.
    WP = x_ref.shape[-1]
    Hc = H + 2            # capture frame (1-px halo): image (h, w) -> (h+1, w+1)
    off = 2 * cw          # total boundary crop per side (cropped twice by cw)

    # --- shared iota masks in the capture frame -----------------------------
    rr = jax.lax.broadcasted_iota(jnp.int32, (Hc, WP), 0)
    cc = jax.lax.broadcasted_iota(jnp.int32, (Hc, WP), 1)
    valid = (rr >= 1) & (rr <= H) & (cc >= 1) & (cc <= W)
    rpar = (rr + 1) & 1               # image-row parity ((rr - 1) & 1)
    cpar = (cc + 1) & 1               # image-col parity
    bayer_masks = (
        ((rpar == 0) & (cpar == 0)).astype(jnp.float32),   # R
        (rpar != cpar).astype(jnp.float32),                # G
        ((rpar == 1) & (cpar == 1)).astype(jnp.float32),   # B
    )

    # --- per channel: sRGB->linear + separable PSF blur, folded into mosaic --
    mosaic = jnp.zeros((Hc, WP), jnp.float32)
    for ch in range(3):
        xs = x_ref[0, ch]                                  # (Hin, WP)
        # sRGB -> linear (EUP transcendentals; padded zeros stay zero)
        lo = xs / 12.92
        base = jnp.maximum((xs + 0.055) / 1.055, 1e-8)
        hi = jnp.exp(2.4 * jnp.log(base))                  # base ** 2.4
        xl = jnp.where(xs <= 0.04045, lo, hi)

        g = taps[ch]                                       # K static floats, sum 1
        # horizontal (lane) pass: hconv[r, co] = sum_j g[j] * xl[r, co + j - 1]
        hconv = jnp.zeros(xl.shape, jnp.float32)
        for j in range(K):
            hconv = hconv + g[j] * _shift_cols(xl, j - 1)
        # vertical (sublane) pass: cap[ro, :] = sum_i g[i] * hconv[ro + i, :]
        cap = jnp.zeros((Hc, WP), jnp.float32)
        for i in range(K):
            cap = cap + g[i] * hconv[i:i + Hc, :]
        cap = jnp.where(valid, cap, 0.0)                   # kill wrapped/halo lanes
        mosaic = mosaic + bayer_masks[ch] * cap            # RGGB mosaic

    # --- per-sample Gaussian read noise (sigma folded in on the host) --------
    noisy = jnp.where(valid, mosaic + noise_ref[0], 0.0)   # zero halo kept

    # --- bilinear 3x3 demosaic restricted to the cropped output region -------
    # output pixel (po, qo) <-> capture coords (po + off + 1, qo + off + 1);
    # tap (i, j) reads capture coords (po + off + i, qo + off + j).
    po = jax.lax.broadcasted_iota(jnp.int32, (Hout, WP), 0)
    qo = jax.lax.broadcasted_iota(jnp.int32, (Hout, WP), 1)
    rp = [((po + off + i + 1) & 1) for i in (0, 1)]        # tap-row image parity
    cp = [((qo + off + j + 1) & 1) for j in (0, 1)]        # tap-col image parity

    def _site_mask(ch, rpi, cpj):
        if ch == 0:
            return ((rpi == 0) & (cpj == 0)).astype(jnp.float32)   # R sites
        if ch == 1:
            return (rpi != cpj).astype(jnp.float32)                # G sites
        return ((rpi == 1) & (cpj == 1)).astype(jnp.float32)       # B sites

    site = [[[_site_mask(ch, rp[i], cp[j]) for j in range(2)]
             for i in range(2)] for ch in range(3)]

    # hoisted column shifts: 3 lane shifts of `noisy` total, shared by all taps
    shifted = [_shift_cols(noisy, off + j) for j in range(3)]

    for ch in range(3):
        acc = jnp.zeros((Hout, WP), jnp.float32)
        for j in range(3):
            sj = shifted[j]
            for i in range(3):
                wgt = _DEBAYER_KERNELS[ch][i][j]
                if wgt != 0.0:
                    acc = acc + wgt * (site[ch][i & 1][j & 1]
                                       * sj[off + i:off + i + Hout, :])
        # clamp before gamma (read noise can push the linear image below 0)
        acc = jnp.clip(acc, 0.0, 1.0)
        # fused linear -> sRGB
        lo = 12.92 * acc
        base = jnp.maximum(acc, 1e-8)
        hi = 1.055 * jnp.exp(jnp.log(base) / 2.4) - 0.055
        est = jnp.where(acc <= 0.0031308, lo, hi)
        o_ref[0, ch] = est[:, :Wout].astype(o_ref.dtype)


def fused_camera_pass(images, capture_taps, scaled_noise, cw):
    """images: (B, 3, H, W) sRGB.  capture_taps: 3-tuple of K python-float taps.
       scaled_noise: (B, H + 2, WP) sigma * N(0,1).  -> est_images (B, 3, Hout, Wout)."""
    B, C, H, W = images.shape
    K = len(capture_taps[0])
    p = K // 2
    WP = _round_up(W + 2 * p, 128)          # lane-dense minor axis
    Hin = H + 2 * p + 2                     # PSF halo (p) + demosaic halo (1)
    Hout, Wout = H - 4 * cw, W - 4 * cw
    assert C == 3 and Hout > 0 and Wout > 0
    # circularly wrapped lanes from the in-kernel column shifts must never land
    # in a column that survives the valid / output-width masks:
    assert WP - (K - 2) > W, "lane padding too small for PSF column shifts"
    assert WP > W + 2 * cw + 2, "lane padding too small for demosaic shifts"

    # single pad: conv halo (p) + demosaic halo (+1 row) + lane padding
    xpe = jnp.pad(images, ((0, 0), (0, 0), (p + 1, p + 1), (p, WP - W - p)))

    return pl.pallas_call(
        functools.partial(_fused_camera_kernel, H=H, W=W, K=K, cw=cw,
                          Hout=Hout, Wout=Wout, taps=capture_taps),
        out_shape=jax.ShapeDtypeStruct((B, C, Hout, Wout), jnp.float32),
        grid=(B,),
        in_specs=[
            pl.BlockSpec((1, C, Hin, WP), lambda b: (b, 0, 0, 0)),
            pl.BlockSpec((1, H + 2, WP), lambda b: (b, 0, 0)),
        ],
        out_specs=pl.BlockSpec((1, C, Hout, Wout), lambda b: (b, 0, 0, 0)),
        compiler_params=pltpu.CompilerParams(
            dimension_semantics=("parallel",),
            # tiny blocks here; raise this (and H-tile) for production sizes
            vmem_limit_bytes=32 * 1024 * 1024,
        ),
    )(xpe, scaled_noise)


# ----------------------------------------------------------------------------
# Deterministic parameter / constant setup (glue)
# ----------------------------------------------------------------------------
def make_psf_stack_np(n_channels=3, n_depths=4, K=5):
    """Deterministic separable Gaussian PSF stack.
    Returns (taps, psf): taps[c] are the focal-depth 1-D taps (python floats,
    sum to 1); psf is a (1, C, n_depths, K, K) array (each KxK slice sums to 1).
    TODO(synk): a learned / non-separable PSF would be passed to the kernel via
    SMEM instead of being baked in as compile-time constants."""
    ys = np.arange(K, dtype=np.float64) - (K // 2)
    sig = (0.6 + 0.15 * np.arange(n_depths)[None, :]
               + 0.05 * np.arange(n_channels)[:, None])            # (C, D)
    g1 = np.exp(-(ys[None, None, :] ** 2) / (2.0 * sig[:, :, None] ** 2))
    g1 = g1 / g1.sum(-1, keepdims=True)                            # (C, D, K)
    psf = g1[:, :, :, None] * g1[:, :, None, :]                    # (C, D, K, K)
    focal = n_depths // 2
    taps = tuple(tuple(float(v) for v in g1[c, focal]) for c in range(n_channels))
    return taps, jnp.asarray(psf[None], dtype=jnp.float32)         # (1, C, D, K, K)


def crop_boundary(x, w):
    if w == 0:
        return x
    return x[..., w:-w, w:-w]


# ----------------------------------------------------------------------------
# Forward pass (mirrors DepthEstimator.forward with bayer=True, psf_jitter=True)
# ----------------------------------------------------------------------------
def depth_estimator_forward(images, depthmaps, key, hparams):
    # TODO(synk): depth-dependent (occlusion-aware) rendering is not modelled,
    # so depthmaps is unused and captimgs / est_depthmaps are returned as None.
    del depthmaps
    B, C, H, W = images.shape
    cw = hparams["crop_width"]
    K = 5
    p = K // 2
    WP = _round_up(W + 2 * p, 128)

    taps, psf = make_psf_stack_np(C, hparams["n_depths"], K=K)

    # Per-sample read-noise level, folded into a host-drawn Bayer-plane noise
    # tensor so the kernel needs no SMEM scalars / in-kernel PRNG.
    # TODO(synk): at production sizes draw the noise in-kernel
    # (pltpu.prng_seed + pltpu.stateful_normal, per-tile seeds) to avoid this
    # extra HBM read.
    k_sig, k_noise = jax.random.split(key)
    noise_sigma = ((hparams["noise_sigma_max"] - hparams["noise_sigma_min"])
                   * jax.random.uniform(k_sig, (B,), jnp.float32)
                   + hparams["noise_sigma_min"])
    scaled_noise = noise_sigma[:, None, None] * jax.random.normal(
        k_noise, (B, H + 2, WP), jnp.float32)

    # Single fused kernel: sRGB->linear + PSF capture + Bayer + noise +
    # demosaic + crop + linear->sRGB.
    est_images = fused_camera_pass(images, taps, scaled_noise, cw)

    target_images = crop_boundary(images, 2 * cw)

    return DepthEstimatorOutputs(
        captimgs=None, captimgs_linear=None,
        est_images=est_images, est_depthmaps=None,
        target_images=target_images, target_depthmaps=None,
        psf=psf)


# ----------------------------------------------------------------------------
if __name__ == "__main__":
    hp = dict(image_sz=16, crop_width=2, n_depths=4,
              noise_sigma_min=1e-3, noise_sigma_max=5e-3,
              bayer=True, psf_jitter=True, occlusion=True)
    real_sz = hp["image_sz"] + 4 * hp["crop_width"]   # 24

    key = jax.random.PRNGKey(0)
    k_img, k_dep, k_fwd = jax.random.split(key, 3)
    images = jax.random.uniform(k_img, (2, 3, real_sz, real_sz), jnp.float32)
    depthmaps = jax.random.uniform(k_dep, (2, 1, real_sz, real_sz), jnp.float32)

    fwd = jax.jit(functools.partial(depth_estimator_forward, hparams=hp))
    out = fwd(images, depthmaps, k_fwd)
    jax.block_until_ready(out.est_images)
    jax.block_until_ready(out.target_images)
    jax.block_until_ready(out.psf)

    assert out.est_images.shape == (2, 3, hp["image_sz"], hp["image_sz"])
    assert out.target_images.shape == (2, 3, hp["image_sz"], hp["image_sz"])
    assert out.psf.shape == (1, 3, hp["n_depths"], 5, 5)
    assert bool(jnp.all(jnp.isfinite(out.est_images)))
    assert bool(jnp.all(out.est_images >= 0.0)) and bool(jnp.all(out.est_images <= 1.0))
    print("KERNEL_OK")
</pallas_src>

<mosaic_0001>
module attributes {stable_mosaic.version = 11 : i64} {
  func.func @_fused_camera_kernel(%arg0: i32, %arg1: memref<1x3x30x128xf32, #tpu.memory_space<vmem>>, %arg2: memref<1x26x128xf32, #tpu.memory_space<vmem>>, %arg3: memref<1x3x16x16xf32, #tpu.memory_space<vmem>>) attributes {dimension_semantics = [#tpu.dimension_semantics<parallel>], iteration_bounds = array<i64: 2>, scalar_prefetch = 0 : i64, scratch_operands = 0 : i64, tpu.core_type = #tpu.core_type<tc>, window_params = [{transform_indices = @transform_0, window_bounds = array<i64: 1, 3, 30, 128>}, {transform_indices = @transform_1, window_bounds = array<i64: 1, 26, 128>}, {transform_indices = @transform_2, window_bounds = array<i64: 1, 3, 16, 16>}]} {
    %0 = tpu.iota {dimensions = array<i32: 0>} : vector<26x128xi32>
    %1 = tpu.iota {dimensions = array<i32: 1>} : vector<26x128xi32>
    %c1_i32 = arith.constant 1 : i32
    %2 = vector.broadcast %c1_i32 : i32 to vector<26x128xi32>
    %3 = arith.cmpi sge, %0, %2 : vector<26x128xi32>
    %c24_i32 = arith.constant 24 : i32
    %4 = vector.broadcast %c24_i32 : i32 to vector<26x128xi32>
    %5 = arith.cmpi sle, %0, %4 : vector<26x128xi32>
    %6 = arith.andi %3, %5 : vector<26x128xi1>
    %c1_i32_0 = arith.constant 1 : i32
    %7 = vector.broadcast %c1_i32_0 : i32 to vector<26x128xi32>
    %8 = arith.cmpi sge, %1, %7 : vector<26x128xi32>
    %9 = arith.andi %6, %8 : vector<26x128xi1>
    %c24_i32_1 = arith.constant 24 : i32
    %10 = vector.broadcast %c24_i32_1 : i32 to vector<26x128xi32>
    %11 = arith.cmpi sle, %1, %10 : vector<26x128xi32>
    %12 = arith.andi %9, %11 : vector<26x128xi1>
    %c1_i32_2 = arith.constant 1 : i32
    %13 = vector.broadcast %c1_i32_2 : i32 to vector<26x128xi32>
    %14 = arith.addi %0, %13 : vector<26x128xi32>
    %c1_i32_3 = arith.constant 1 : i32
    %15 = vector.broadcast %c1_i32_3 : i32 to vector<26x128xi32>
    %16 = arith.andi %14, %15 : vector<26x128xi32>
    %c1_i32_4 = arith.constant 1 : i32
    %17 = vector.broadcast %c1_i32_4 : i32 to vector<26x128xi32>
    %18 = arith.addi %1, %17 : vector<26x128xi32>
    %c1_i32_5 = arith.constant 1 : i32
    %19 = vector.broadcast %c1_i32_5 : i32 to vector<26x128xi32>
    %20 = arith.andi %18, %19 : vector<26x128xi32>
    %c0_i32 = arith.constant 0 : i32
    %21 = vector.broadcast %c0_i32 : i32 to vector<26x128xi32>
    %22 = arith.cmpi eq, %16, %21 : vector<26x128xi32>
    %c0_i32_6 = arith.constant 0 : i32
    %23 = vector.broadcast %c0_i32_6 : i32 to vector<26x128xi32>
    %24 = arith.cmpi eq, %20, %23 : vector<26x128xi32>
    %25 = arith.andi %22, %24 : vector<26x128xi1>
    %26 = arith.extui %25 : vector<26x128xi1> to vector<26x128xi32>
    %27 = arith.sitofp %26 : vector<26x128xi32> to vector<26x128xf32>
    %28 = arith.cmpi ne, %16, %20 : vector<26x128xi32>
    %29 = arith.extui %28 : vector<26x128xi1> to vector<26x128xi32>
    %30 = arith.sitofp %29 : vector<26x128xi32> to vector<26x128xf32>
    %c1_i32_7 = arith.constant 1 : i32
    %31 = vector.broadcast %c1_i32_7 : i32 to vector<26x128xi32>
    %32 = arith.cmpi eq, %16, %31 : vector<26x128xi32>
    %c1_i32_8 = arith.constant 1 : i32
    %33 = vector.broadcast %c1_i32_8 : i32 to vector<26x128xi32>
    %34 = arith.cmpi eq, %20, %33 : vector<26x128xi32>
    %35 = arith.andi %32, %34 : vector<26x128xi1>
    %36 = arith.extui %35 : vector<26x128xi1> to vector<26x128xi32>
    %37 = arith.sitofp %36 : vector<26x128xi32> to vector<26x128xf32>
    %cst = arith.constant 0.000000e+00 : f32
    %38 = vector.broadcast %cst : f32 to vector<26x128xf32>
    %c0 = arith.constant 0 : index
    %c0_9 = arith.constant 0 : index
    %c0_10 = arith.constant 0 : index
    %c0_11 = arith.constant 0 : index
    %39 = vector.load %arg1[%c0, %c0_9, %c0_10, %c0_11] : memref<1x3x30x128xf32, #tpu.memory_space<vmem>>, vector<1x1x30x128xf32>
    %40 = vector.shape_cast %39 : vector<1x1x30x128xf32> to vector<30x128xf32>
    %cst_12 = arith.constant 1.292000e+01 : f32
    %41 = vector.broadcast %cst_12 : f32 to vector<30x128xf32>
    %42 = arith.divf %40, %41 : vector<30x128xf32>
    %cst_13 = arith.constant 5.500000e-02 : f32
    %43 = vector.broadcast %cst_13 : f32 to vector<30x128xf32>
    %44 = arith.addf %40, %43 : vector<30x128xf32>
    %cst_14 = arith.constant 1.055000e+00 : f32
    %45 = vector.broadcast %cst_14 : f32 to vector<30x128xf32>
    %46 = arith.divf %44, %45 : vector<30x128xf32>
    %cst_15 = arith.constant 9.99999993E-9 : f32
    %47 = vector.broadcast %cst_15 : f32 to vector<30x128xf32>
    %48 = arith.maximumf %46, %47 : vector<30x128xf32>
    %49 = math.log %48 : vector<30x128xf32>
    %cst_16 = arith.constant 2.400000e+00 : f32
    %50 = vector.broadcast %cst_16 : f32 to vector<30x128xf32>
    %51 = arith.mulf %50, %49 : vector<30x128xf32>
    %52 = math.exp %51 : vector<30x128xf32>
    %cst_17 = arith.constant 4.045000e-02 : f32
    %53 = vector.broadcast %cst_17 : f32 to vector<30x128xf32>
    %54 = arith.cmpf ole, %40, %53 : vector<30x128xf32>
    %55 = arith.select %54, %42, %52 : vector<30x128xi1>, vector<30x128xf32>
    %cst_18 = arith.constant 0.000000e+00 : f32
    %56 = vector.broadcast %cst_18 : f32 to vector<30x128xf32>
    %57 = vector.extract_strided_slice %55 {offsets = [0, 127], sizes = [30, 1], strides = [1, 1]} : vector<30x128xf32> to vector<30x1xf32>
    %58 = vector.extract_strided_slice %55 {offsets = [0, 0], sizes = [30, 127], strides = [1, 1]} : vector<30x128xf32> to vector<30x127xf32>
    %59 = tpu.concatenate %57, %58 in 1 : vector<30x1xf32>, vector<30x127xf32> -> vector<30x128xf32>
    %cst_19 = arith.constant 0.0376570523 : f32
    %60 = vector.broadcast %cst_19 : f32 to vector<30x128xf32>
    %61 = arith.mulf %60, %59 : vector<30x128xf32>
    %62 = arith.addf %56, %61 : vector<30x128xf32>
    %cst_20 = arith.constant 0.239935979 : f32
    %63 = vector.broadcast %cst_20 : f32 to vector<30x128xf32>
    %64 = arith.mulf %63, %55 : vector<30x128xf32>
    %65 = arith.addf %62, %64 : vector<30x128xf32>
    %66 = vector.extract_strided_slice %55 {offsets = [0, 1], sizes = [30, 127], strides = [1, 1]} : vector<30x128xf32> to vector<30x127xf32>
    %67 = vector.extract_strided_slice %55 {offsets = [0, 0], sizes = [30, 1], strides = [1, 1]} : vector<30x128xf32> to vector<30x1xf32>
    %68 = tpu.concatenate %66, %67 in 1 : vector<30x127xf32>, vector<30x1xf32> -> vector<30x128xf32>
    %cst_21 = arith.constant 0.444813937 : f32
    %69 = vector.broadcast %cst_21 : f32 to vector<30x128xf32>
    %70 = arith.mulf %69, %68 : vector<30x128xf32>
    %71 = arith.addf %65, %70 : vector<30x128xf32>
    %72 = vector.extract_strided_slice %55 {offsets = [0, 2], sizes = [30, 126], strides = [1, 1]} : vector<30x128xf32> to vector<30x126xf32>
    %73 = vector.extract_strided_slice %55 {offsets = [0, 0], sizes = [30, 2], strides = [1, 1]} : vector<30x128xf32> to vector<30x2xf32>
    %74 = tpu.concatenate %72, %73 in 1 : vector<30x126xf32>, vector<30x2xf32> -> vector<30x128xf32>
    %cst_22 = arith.constant 0.239935979 : f32
    %75 = vector.broadcast %cst_22 : f32 to vector<30x128xf32>
    %76 = arith.mulf %75, %74 : vector<30x128xf32>
    %77 = arith.addf %71, %76 : vector<30x128xf32>
    %78 = vector.extract_strided_slice %55 {offsets = [0, 3], sizes = [30, 125], strides = [1, 1]} : vector<30x128xf32> to vector<30x125xf32>
    %79 = vector.extract_strided_slice %55 {offsets = [0, 0], sizes = [30, 3], strides = [1, 1]} : vector<30x128xf32> to vector<30x3xf32>
    %80 = tpu.concatenate %78, %79 in 1 : vector<30x125xf32>, vector<30x3xf32> -> vector<30x128xf32>
    %cst_23 = arith.constant 0.0376570523 : f32
    %81 = vector.broadcast %cst_23 : f32 to vector<30x128xf32>
    %82 = arith.mulf %81, %80 : vector<30x128xf32>
    %83 = arith.addf %77, %82 : vector<30x128xf32>
    %cst_24 = arith.constant 0.000000e+00 : f32
    %84 = vector.broadcast %cst_24 : f32 to vector<26x128xf32>
    %85 = vector.extract_strided_slice %83 {offsets = [0, 0], sizes = [26, 128], strides = [1, 1]} : vector<30x128xf32> to vector<26x128xf32>
    %cst_25 = arith.constant 0.0376570523 : f32
    %86 = vector.broadcast %cst_25 : f32 to vector<26x128xf32>
    %87 = arith.mulf %86, %85 : vector<26x128xf32>
    %88 = arith.addf %84, %87 : vector<26x128xf32>
    %89 = vector.extract_strided_slice %83 {offsets = [1, 0], sizes = [26, 128], strides = [1, 1]} : vector<30x128xf32> to vector<26x128xf32>
    %cst_26 = arith.constant 0.239935979 : f32
    %90 = vector.broadcast %cst_26 : f32 to vector<26x128xf32>
    %91 = arith.mulf %90, %89 : vector<26x128xf32>
    %92 = arith.addf %88, %91 : vector<26x128xf32>
    %93 = vector.extract_strided_slice %83 {offsets = [2, 0], sizes = [26, 128], strides = [1, 1]} : vector<30x128xf32> to vector<26x128xf32>
    %cst_27 = arith.constant 0.444813937 : f32
    %94 = vector.broadcast %cst_27 : f32 to vector<26x128xf32>
    %95 = arith.mulf %94, %93 : vector<26x128xf32>
    %96 = arith.addf %92, %95 : vector<26x128xf32>
    %97 = vector.extract_strided_slice %83 {offsets = [3, 0], sizes = [26, 128], strides = [1, 1]} : vector<30x128xf32> to vector<26x128xf32>
    %cst_28 = arith.constant 0.239935979 : f32
    %98 = vector.broadcast %cst_28 : f32 to vector<26x128xf32>
    %99 = arith.mulf %98, %97 : vector<26x128xf32>
    %100 = arith.addf %96, %99 : vector<26x128xf32>
    %101 = vector.extract_strided_slice %83 {offsets = [4, 0], sizes = [26, 128], strides = [1, 1]} : vector<30x128xf32> to vector<26x128xf32>
    %cst_29 = arith.constant 0.0376570523 : f32
    %102 = vector.broadcast %cst_29 : f32 to vector<26x128xf32>
    %103 = arith.mulf %102, %101 : vector<26x128xf32>
    %104 = arith.addf %100, %103 : vector<26x128xf32>
    %cst_30 = arith.constant 0.000000e+00 : f32
    %105 = vector.broadcast %cst_30 : f32 to vector<26x128xf32>
    %106 = arith.select %12, %104, %105 : vector<26x128xi1>, vector<26x128xf32>
    %107 = arith.mulf %27, %106 : vector<26x128xf32>
    %108 = arith.addf %38, %107 : vector<26x128xf32>
    %c0_31 = arith.constant 0 : index
    %c1 = arith.constant 1 : index
    %c0_32 = arith.constant 0 : index
    %c0_33 = arith.constant 0 : index
    %109 = vector.load %arg1[%c0_31, %c1, %c0_32, %c0_33] : memref<1x3x30x128xf32, #tpu.memory_space<vmem>>, vector<1x1x30x128xf32>
    %110 = vector.shape_cast %109 : vector<1x1x30x128xf32> to vector<30x128xf32>
    %cst_34 = arith.constant 1.292000e+01 : f32
    %111 = vector.broadcast %cst_34 : f32 to vector<30x128xf32>
    %112 = arith.divf %110, %111 : vector<30x128xf32>
    %cst_35 = arith.constant 5.500000e-02 : f32
    %113 = vector.broadcast %cst_35 : f32 to vector<30x128xf32>
    %114 = arith.addf %110, %113 : vector<30x128xf32>
    %cst_36 = arith.constant 1.055000e+00 : f32
    %115 = vector.broadcast %cst_36 : f32 to vector<30x128xf32>
    %116 = arith.divf %114, %115 : vector<30x128xf32>
    %cst_37 = arith.constant 9.99999993E-9 : f32
    %117 = vector.broadcast %cst_37 : f32 to vector<30x128xf32>
    %118 = arith.maximumf %116, %117 : vector<30x128xf32>
    %119 = math.log %118 : vector<30x128xf32>
    %cst_38 = arith.constant 2.400000e+00 : f32
    %120 = vector.broadcast %cst_38 : f32 to vector<30x128xf32>
    %121 = arith.mulf %120, %119 : vector<30x128xf32>
    %122 = math.exp %121 : vector<30x128xf32>
    %cst_39 = arith.constant 4.045000e-02 : f32
    %123 = vector.broadcast %cst_39 : f32 to vector<30x128xf32>
    %124 = arith.cmpf ole, %110, %123 : vector<30x128xf32>
    %125 = arith.select %124, %112, %122 : vector<30x128xi1>, vector<30x128xf32>
    %cst_40 = arith.constant 0.000000e+00 : f32
    %126 = vector.broadcast %cst_40 : f32 to vector<30x128xf32>
    %127 = vector.extract_strided_slice %125 {offsets = [0, 127], sizes = [30, 1], strides = [1, 1]} : vector<30x128xf32> to vector<30x1xf32>
    %128 = vector.extract_strided_slice %125 {offsets = [0, 0], sizes = [30, 127], strides = [1, 1]} : vector<30x128xf32> to vector<30x127xf32>
    %129 = tpu.concatenate %127, %128 in 1 : vector<30x1xf32>, vector<30x127xf32> -> vector<30x128xf32>
    %cst_41 = arith.constant 0.046058774 : f32
    %130 = vector.broadcast %cst_41 : f32 to vector<30x128xf32>
    %131 = arith.mulf %130, %129 : vector<30x128xf32>
    %132 = arith.addf %126, %131 : vector<30x128xf32>
    %cst_42 = arith.constant 0.242734462 : f32
    %133 = vector.broadcast %cst_42 : f32 to vector<30x128xf32>
    %134 = arith.mulf %133, %125 : vector<30x128xf32>
    %135 = arith.addf %132, %134 : vector<30x128xf32>
    %136 = vector.extract_strided_slice %125 {offsets = [0, 1], sizes = [30, 127], strides = [1, 1]} : vector<30x128xf32> to vector<30x127xf32>
    %137 = vector.extract_strided_slice %125 {offsets = [0, 0], sizes = [30, 1], strides = [1, 1]} : vector<30x128xf32> to vector<30x1xf32>
    %138 = tpu.concatenate %136, %137 in 1 : vector<30x127xf32>, vector<30x1xf32> -> vector<30x128xf32>
    %cst_43 = arith.constant 0.422413528 : f32
    %139 = vector.broadcast %cst_43 : f32 to vector<30x128xf32>
    %140 = arith.mulf %139, %138 : vector<30x128xf32>
    %141 = arith.addf %135, %140 : vector<30x128xf32>
    %142 = vector.extract_strided_slice %125 {offsets = [0, 2], sizes = [30, 126], strides = [1, 1]} : vector<30x128xf32> to vector<30x126xf32>
    %143 = vector.extract_strided_slice %125 {offsets = [0, 0], sizes = [30, 2], strides = [1, 1]} : vector<30x128xf32> to vector<30x2xf32>
    %144 = tpu.concatenate %142, %143 in 1 : vector<30x126xf32>, vector<30x2xf32> -> vector<30x128xf32>
    %cst_44 = arith.constant 0.242734462 : f32
    %145 = vector.broadcast %cst_44 : f32 to vector<30x128xf32>
    %146 = arith.mulf %145, %144 : vector<30x128xf32>
    %147 = arith.addf %141, %146 : vector<30x128xf32>
    %148 = vector.extract_strided_slice %125 {offsets = [0, 3], sizes = [30, 125], strides = [1, 1]} : vector<30x128xf32> to vector<30x125xf32>
    %149 = vector.extract_strided_slice %125 {offsets = [0, 0], sizes = [30, 3], strides = [1, 1]} : vector<30x128xf32> to vector<30x3xf32>
    %150 = tpu.concatenate %148, %149 in 1 : vector<30x125xf32>, vector<30x3xf32> -> vector<30x128xf32>
    %cst_45 = arith.constant 0.046058774 : f32
    %151 = vector.broadcast %cst_45 : f32 to vector<30x128xf32>
    %152 = arith.mulf %151, %150 : vector<30x128xf32>
    %153 = arith.addf %147, %152 : vector<30x128xf32>
    %cst_46 = arith.constant 0.000000e+00 : f32
    %154 = vector.broadcast %cst_46 : f32 to vector<26x128xf32>
    %155 = vector.extract_strided_slice %153 {offsets = [0, 0], sizes = [26, 128], strides = [1, 1]} : vector<30x128xf32> to vector<26x128xf32>
    %cst_47 = arith.constant 0.046058774 : f32
    %156 = vector.broadcast %cst_47 : f32 to vector<26x128xf32>
    %157 = arith.mulf %156, %155 : vector<26x128xf32>
    %158 = arith.addf %154, %157 : vector<26x128xf32>
    %159 = vector.extract_strided_slice %153 {offsets = [1, 0], sizes = [26, 128], strides = [1, 1]} : vector<30x128xf32> to vector<26x128xf32>
    %cst_48 = arith.constant 0.242734462 : f32
    %160 = vector.broadcast %cst_48 : f32 to vector<26x128xf32>
    %161 = arith.mulf %160, %159 : vector<26x128xf32>
    %162 = arith.addf %158, %161 : vector<26x128xf32>
    %163 = vector.extract_strided_slice %153 {offsets = [2, 0], sizes = [26, 128], strides = [1, 1]} : vector<30x128xf32> to vector<26x128xf32>
    %cst_49 = arith.constant 0.422413528 : f32
    %164 = vector.broadcast %cst_49 : f32 to vector<26x128xf32>
    %165 = arith.mulf %164, %163 : vector<26x128xf32>
    %166 = arith.addf %162, %165 : vector<26x128xf32>
    %167 = vector.extract_strided_slice %153 {offsets = [3, 0], sizes = [26, 128], strides = [1, 1]} : vector<30x128xf32> to vector<26x128xf32>
    %cst_50 = arith.constant 0.242734462 : f32
    %168 = vector.broadcast %cst_50 : f32 to vector<26x128xf32>
    %169 = arith.mulf %168, %167 : vector<26x128xf32>
    %170 = arith.addf %166, %169 : vector<26x128xf32>
    %171 = vector.extract_strided_slice %153 {offsets = [4, 0], sizes = [26, 128], strides = [1, 1]} : vector<30x128xf32> to vector<26x128xf32>
    %cst_51 = arith.constant 0.046058774 : f32
    %172 = vector.broadcast %cst_51 : f32 to vector<26x128xf32>
    %173 = arith.mulf %172, %171 : vector<26x128xf32>
    %174 = arith.addf %170, %173 : vector<26x128xf32>
    %cst_52 = arith.constant 0.000000e+00 : f32
    %175 = vector.broadcast %cst_52 : f32 to vector<26x128xf32>
    %176 = arith.select %12, %174, %175 : vector<26x128xi1>, vector<26x128xf32>
    %177 = arith.mulf %30, %176 : vector<26x128xf32>
    %178 = arith.addf %108, %177 : vector<26x128xf32>
    %c0_53 = arith.constant 0 : index
    %c2 = arith.constant 2 : index
    %c0_54 = arith.constant 0 : index
    %c0_55 = arith.constant 0 : index
    %179 = vector.load %arg1[%c0_53, %c2, %c0_54, %c0_55] : memref<1x3x30x128xf32, #tpu.memory_space<vmem>>, vector<1x1x30x128xf32>
    %180 = vector.shape_cast %179 : vector<1x1x30x128xf32> to vector<30x128xf32>
    %cst_56 = arith.constant 1.292000e+01 : f32
    %181 = vector.broadcast %cst_56 : f32 to vector<30x128xf32>
    %182 = arith.divf %180, %181 : vector<30x128xf32>
    %cst_57 = arith.constant 5.500000e-02 : f32
    %183 = vector.broadcast %cst_57 : f32 to vector<30x128xf32>
    %184 = arith.addf %180, %183 : vector<30x128xf32>
    %cst_58 = arith.constant 1.055000e+00 : f32
    %185 = vector.broadcast %cst_58 : f32 to vector<30x128xf32>
    %186 = arith.divf %184, %185 : vector<30x128xf32>
    %cst_59 = arith.constant 9.99999993E-9 : f32
    %187 = vector.broadcast %cst_59 : f32 to vector<30x128xf32>
    %188 = arith.maximumf %186, %187 : vector<30x128xf32>
    %189 = math.log %188 : vector<30x128xf32>
    %cst_60 = arith.constant 2.400000e+00 : f32
    %190 = vector.broadcast %cst_60 : f32 to vector<30x128xf32>
    %191 = arith.mulf %190, %189 : vector<30x128xf32>
    %192 = math.exp %191 : vector<30x128xf32>
    %cst_61 = arith.constant 4.045000e-02 : f32
    %193 = vector.broadcast %cst_61 : f32 to vector<30x128xf32>
    %194 = arith.cmpf ole, %180, %193 : vector<30x128xf32>
    %195 = arith.select %194, %182, %192 : vector<30x128xi1>, vector<30x128xf32>
    %cst_62 = arith.constant 0.000000e+00 : f32
    %196 = vector.broadcast %cst_62 : f32 to vector<30x128xf32>
    %197 = vector.extract_strided_slice %195 {offsets = [0, 127], sizes = [30, 1], strides = [1, 1]} : vector<30x128xf32> to vector<30x1xf32>
    %198 = vector.extract_strided_slice %195 {offsets = [0, 0], sizes = [30, 127], strides = [1, 1]} : vector<30x128xf32> to vector<30x127xf32>
    %199 = tpu.concatenate %197, %198 in 1 : vector<30x1xf32>, vector<30x127xf32> -> vector<30x128xf32>
    %cst_63 = arith.constant 0.054488685 : f32
    %200 = vector.broadcast %cst_63 : f32 to vector<30x128xf32>
    %201 = arith.mulf %200, %199 : vector<30x128xf32>
    %202 = arith.addf %196, %201 : vector<30x128xf32>
    %cst_64 = arith.constant 0.244201347 : f32
    %203 = vector.broadcast %cst_64 : f32 to vector<30x128xf32>
    %204 = arith.mulf %203, %195 : vector<30x128xf32>
    %205 = arith.addf %202, %204 : vector<30x128xf32>
    %206 = vector.extract_strided_slice %195 {offsets = [0, 1], sizes = [30, 127], strides = [1, 1]} : vector<30x128xf32> to vector<30x127xf32>
    %207 = vector.extract_strided_slice %195 {offsets = [0, 0], sizes = [30, 1], strides = [1, 1]} : vector<30x128xf32> to vector<30x1xf32>
    %208 = tpu.concatenate %206, %207 in 1 : vector<30x127xf32>, vector<30x1xf32> -> vector<30x128xf32>
    %cst_65 = arith.constant 0.402619958 : f32
    %209 = vector.broadcast %cst_65 : f32 to vector<30x128xf32>
    %210 = arith.mulf %209, %208 : vector<30x128xf32>
    %211 = arith.addf %205, %210 : vector<30x128xf32>
    %212 = vector.extract_strided_slice %195 {offsets = [0, 2], sizes = [30, 126], strides = [1, 1]} : vector<30x128xf32> to vector<30x126xf32>
    %213 = vector.extract_strided_slice %195 {offsets = [0, 0], sizes = [30, 2], strides = [1, 1]} : vector<30x128xf32> to vector<30x2xf32>
    %214 = tpu.concatenate %212, %213 in 1 : vector<30x126xf32>, vector<30x2xf32> -> vector<30x128xf32>
    %cst_66 = arith.constant 0.244201347 : f32
    %215 = vector.broadcast %cst_66 : f32 to vector<30x128xf32>
    %216 = arith.mulf %215, %214 : vector<30x128xf32>
    %217 = arith.addf %211, %216 : vector<30x128xf32>
    %218 = vector.extract_strided_slice %195 {offsets = [0, 3], sizes = [30, 125], strides = [1, 1]} : vector<30x128xf32> to vector<30x125xf32>
    %219 = vector.extract_strided_slice %195 {offsets = [0, 0], sizes = [30, 3], strides = [1, 1]} : vector<30x128xf32> to vector<30x3xf32>
    %220 = tpu.concatenate %218, %219 in 1 : vector<30x125xf32>, vector<30x3xf32> -> vector<30x128xf32>
    %cst_67 = arith.constant 0.054488685 : f32
    %221 = vector.broadcast %cst_67 : f32 to vector<30x128xf32>
    %222 = arith.mulf %221, %220 : vector<30x128xf32>
    %223 = arith.addf %217, %222 : vector<30x128xf32>
    %cst_68 = arith.constant 0.000000e+00 : f32
    %224 = vector.broadcast %cst_68 : f32 to vector<26x128xf32>
    %225 = vector.extract_strided_slice %223 {offsets = [0, 0], sizes = [26, 128], strides = [1, 1]} : vector<30x128xf32> to vector<26x128xf32>
    %cst_69 = arith.constant 0.054488685 : f32
    %226 = vector.broadcast %cst_69 : f32 to vector<26x128xf32>
    %227 = arith.mulf %226, %225 : vector<26x128xf32>
    %228 = arith.addf %224, %227 : vector<26x128xf32>
    %229 = vector.extract_strided_slice %223 {offsets = [1, 0], sizes = [26, 128], strides = [1, 1]} : vector<30x128xf32> to vector<26x128xf32>
    %cst_70 = arith.constant 0.244201347 : f32
    %230 = vector.broadcast %cst_70 : f32 to vector<26x128xf32>
    %231 = arith.mulf %230, %229 : vector<26x128xf32>
    %232 = arith.addf %228, %231 : vector<26x128xf32>
    %233 = vector.extract_strided_slice %223 {offsets = [2, 0], sizes = [26, 128], strides = [1, 1]} : vector<30x128xf32> to vector<26x128xf32>
    %cst_71 = arith.constant 0.402619958 : f32
    %234 = vector.broadcast %cst_71 : f32 to vector<26x128xf32>
    %235 = arith.mulf %234, %233 : vector<26x128xf32>
    %236 = arith.addf %232, %235 : vector<26x128xf32>
    %237 = vector.extract_strided_slice %223 {offsets = [3, 0], sizes = [26, 128], strides = [1, 1]} : vector<30x128xf32> to vector<26x128xf32>
    %cst_72 = arith.constant 0.244201347 : f32
    %238 = vector.broadcast %cst_72 : f32 to vector<26x128xf32>
    %239 = arith.mulf %238, %237 : vector<26x128xf32>
    %240 = arith.addf %236, %239 : vector<26x128xf32>
    %241 = vector.extract_strided_slice %223 {offsets = [4, 0], sizes = [26, 128], strides = [1, 1]} : vector<30x128xf32> to vector<26x128xf32>
    %cst_73 = arith.constant 0.054488685 : f32
    %242 = vector.broadcast %cst_73 : f32 to vector<26x128xf32>
    %243 = arith.mulf %242, %241 : vector<26x128xf32>
    %244 = arith.addf %240, %243 : vector<26x128xf32>
    %cst_74 = arith.constant 0.000000e+00 : f32
    %245 = vector.broadcast %cst_74 : f32 to vector<26x128xf32>
    %246 = arith.select %12, %244, %245 : vector<26x128xi1>, vector<26x128xf32>
    %247 = arith.mulf %37, %246 : vector<26x128xf32>
    %248 = arith.addf %178, %247 : vector<26x128xf32>
    %c0_75 = arith.constant 0 : index
    %c0_76 = arith.constant 0 : index
    %c0_77 = arith.constant 0 : index
    %249 = vector.load %arg2[%c0_75, %c0_76, %c0_77] : memref<1x26x128xf32, #tpu.memory_space<vmem>>, vector<1x26x128xf32>
    %250 = vector.shape_cast %249 : vector<1x26x128xf32> to vector<26x128xf32>
    %251 = arith.addf %248, %250 : vector<26x128xf32>
    %cst_78 = arith.constant 0.000000e+00 : f32
    %252 = vector.broadcast %cst_78 : f32 to vector<26x128xf32>
    %253 = arith.select %12, %251, %252 : vector<26x128xi1>, vector<26x128xf32>
    %254 = tpu.iota {dimensions = array<i32: 0>} : vector<16x128xi32>
    %255 = tpu.iota {dimensions = array<i32: 1>} : vector<16x128xi32>
    %c4_i32 = arith.constant 4 : i32
    %256 = vector.broadcast %c4_i32 : i32 to vector<16x128xi32>
    %257 = arith.addi %254, %256 : vector<16x128xi32>
    %c0_i32_79 = arith.constant 0 : i32
    %258 = vector.broadcast %c0_i32_79 : i32 to vector<16x128xi32>
    %259 = arith.addi %257, %258 : vector<16x128xi32>
    %c1_i32_80 = arith.constant 1 : i32
    %260 = vector.broadcast %c1_i32_80 : i32 to vector<16x128xi32>
    %261 = arith.addi %259, %260 : vector<16x128xi32>
    %c1_i32_81 = arith.constant 1 : i32
    %262 = vector.broadcast %c1_i32_81 : i32 to vector<16x128xi32>
    %263 = arith.andi %261, %262 : vector<16x128xi32>
    %c4_i32_82 = arith.constant 4 : i32
    %264 = vector.broadcast %c4_i32_82 : i32 to vector<16x128xi32>
    %265 = arith.addi %254, %264 : vector<16x128xi32>
    %c1_i32_83 = arith.constant 1 : i32
    %266 = vector.broadcast %c1_i32_83 : i32 to vector<16x128xi32>
    %267 = arith.addi %265, %266 : vector<16x128xi32>
    %c1_i32_84 = arith.constant 1 : i32
    %268 = vector.broadcast %c1_i32_84 : i32 to vector<16x128xi32>
    %269 = arith.addi %267, %268 : vector<16x128xi32>
    %c1_i32_85 = arith.constant 1 : i32
    %270 = vector.broadcast %c1_i32_85 : i32 to vector<16x128xi32>
    %271 = arith.andi %269, %270 : vector<16x128xi32>
    %c4_i32_86 = arith.constant 4 : i32
    %272 = vector.broadcast %c4_i32_86 : i32 to vector<16x128xi32>
    %273 = arith.addi %255, %272 : vector<16x128xi32>
    %c0_i32_87 = arith.constant 0 : i32
    %274 = vector.broadcast %c0_i32_87 : i32 to vector<16x128xi32>
    %275 = arith.addi %273, %274 : vector<16x128xi32>
    %c1_i32_88 = arith.constant 1 : i32
    %276 = vector.broadcast %c1_i32_88 : i32 to vector<16x128xi32>
    %277 = arith.addi %275, %276 : vector<16x128xi32>
    %c1_i32_89 = arith.constant 1 : i32
    %278 = vector.broadcast %c1_i32_89 : i32 to vector<16x128xi32>
    %279 = arith.andi %277, %278 : vector<16x128xi32>
    %c4_i32_90 = arith.constant 4 : i32
    %280 = vector.broadcast %c4_i32_90 : i32 to vector<16x128xi32>
    %281 = arith.addi %255, %280 : vector<16x128xi32>
    %c1_i32_91 = arith.constant 1 : i32
    %282 = vector.broadcast %c1_i32_91 : i32 to vector<16x128xi32>
    %283 = arith.addi %281, %282 : vector<16x128xi32>
    %c1_i32_92 = arith.constant 1 : i32
    %284 = vector.broadcast %c1_i32_92 : i32 to vector<16x128xi32>
    %285 = arith.addi %283, %284 : vector<16x128xi32>
    %c1_i32_93 = arith.constant 1 : i32
    %286 = vector.broadcast %c1_i32_93 : i32 to vector<16x128xi32>
    %287 = arith.andi %285, %286 : vector<16x128xi32>
    %c0_i32_94 = arith.constant 0 : i32
    %288 = vector.broadcast %c0_i32_94 : i32 to vector<16x128xi32>
    %289 = arith.cmpi eq, %263, %288 : vector<16x128xi32>
    %c0_i32_95 = arith.constant 0 : i32
    %290 = vector.broadcast %c0_i32_95 : i32 to vector<16x128xi32>
    %291 = arith.cmpi eq, %279, %290 : vector<16x128xi32>
    %292 = arith.andi %289, %291 : vector<16x128xi1>
    %293 = arith.extui %292 : vector<16x128xi1> to vector<16x128xi32>
    %294 = arith.sitofp %293 : vector<16x128xi32> to vector<16x128xf32>
    %c0_i32_96 = arith.constant 0 : i32
    %295 = vector.broadcast %c0_i32_96 : i32 to vector<16x128xi32>
    %296 = arith.cmpi eq, %263, %295 : vector<16x128xi32>
    %c0_i32_97 = arith.constant 0 : i32
    %297 = vector.broadcast %c0_i32_97 : i32 to vector<16x128xi32>
    %298 = arith.cmpi eq, %287, %297 : vector<16x128xi32>
    %299 = arith.andi %296, %298 : vector<16x128xi1>
    %300 = arith.extui %299 : vector<16x128xi1> to vector<16x128xi32>
    %301 = arith.sitofp %300 : vector<16x128xi32> to vector<16x128xf32>
    %c0_i32_98 = arith.constant 0 : i32
    %302 = vector.broadcast %c0_i32_98 : i32 to vector<16x128xi32>
    %303 = arith.cmpi eq, %271, %302 : vector<16x128xi32>
    %c0_i32_99 = arith.constant 0 : i32
    %304 = vector.broadcast %c0_i32_99 : i32 to vector<16x128xi32>
    %305 = arith.cmpi eq, %279, %304 : vector<16x128xi32>
    %306 = arith.andi %303, %305 : vector<16x128xi1>
    %307 = arith.extui %306 : vector<16x128xi1> to vector<16x128xi32>
    %308 = arith.sitofp %307 : vector<16x128xi32> to vector<16x128xf32>
    %c0_i32_100 = arith.constant 0 : i32
    %309 = vector.broadcast %c0_i32_100 : i32 to vector<16x128xi32>
    %310 = arith.cmpi eq, %271, %309 : vector<16x128xi32>
    %c0_i32_101 = arith.constant 0 : i32
    %311 = vector.broadcast %c0_i32_101 : i32 to vector<16x128xi32>
    %312 = arith.cmpi eq, %287, %311 : vector<16x128xi32>
    %313 = arith.andi %310, %312 : vector<16x128xi1>
    %314 = arith.extui %313 : vector<16x128xi1> to vector<16x128xi32>
    %315 = arith.sitofp %314 : vector<16x128xi32> to vector<16x128xf32>
    %316 = arith.cmpi ne, %263, %287 : vector<16x128xi32>
    %317 = arith.extui %316 : vector<16x128xi1> to vector<16x128xi32>
    %318 = arith.sitofp %317 : vector<16x128xi32> to vector<16x128xf32>
    %319 = arith.cmpi ne, %271, %279 : vector<16x128xi32>
    %320 = arith.extui %319 : vector<16x128xi1> to vector<16x128xi32>
    %321 = arith.sitofp %320 : vector<16x128xi32> to vector<16x128xf32>
    %322 = arith.cmpi ne, %271, %287 : vector<16x128xi32>
    %323 = arith.extui %322 : vector<16x128xi1> to vector<16x128xi32>
    %324 = arith.sitofp %323 : vector<16x128xi32> to vector<16x128xf32>
    %c1_i32_102 = arith.constant 1 : i32
    %325 = vector.broadcast %c1_i32_102 : i32 to vector<16x128xi32>
    %326 = arith.cmpi eq, %263, %325 : vector<16x128xi32>
    %c1_i32_103 = arith.constant 1 : i32
    %327 = vector.broadcast %c1_i32_103 : i32 to vector<16x128xi32>
    %328 = arith.cmpi eq, %279, %327 : vector<16x128xi32>
    %329 = arith.andi %326, %328 : vector<16x128xi1>
    %330 = arith.extui %329 : vector<16x128xi1> to vector<16x128xi32>
    %331 = arith.sitofp %330 : vector<16x128xi32> to vector<16x128xf32>
    %c1_i32_104 = arith.constant 1 : i32
    %332 = vector.broadcast %c1_i32_104 : i32 to vector<16x128xi32>
    %333 = arith.cmpi eq, %263, %332 : vector<16x128xi32>
    %c1_i32_105 = arith.constant 1 : i32
    %334 = vector.broadcast %c1_i32_105 : i32 to vector<16x128xi32>
    %335 = arith.cmpi eq, %287, %334 : vector<16x128xi32>
    %336 = arith.andi %333, %335 : vector<16x128xi1>
    %337 = arith.extui %336 : vector<16x128xi1> to vector<16x128xi32>
    %338 = arith.sitofp %337 : vector<16x128xi32> to vector<16x128xf32>
    %c1_i32_106 = arith.constant 1 : i32
    %339 = vector.broadcast %c1_i32_106 : i32 to vector<16x128xi32>
    %340 = arith.cmpi eq, %271, %339 : vector<16x128xi32>
    %c1_i32_107 = arith.constant 1 : i32
    %341 = vector.broadcast %c1_i32_107 : i32 to vector<16x128xi32>
    %342 = arith.cmpi eq, %279, %341 : vector<16x128xi32>
    %343 = arith.andi %340, %342 : vector<16x128xi1>
    %344 = arith.extui %343 : vector<16x128xi1> to vector<16x128xi32>
    %345 = arith.sitofp %344 : vector<16x128xi32> to vector<16x128xf32>
    %c1_i32_108 = arith.constant 1 : i32
    %346 = vector.broadcast %c1_i32_108 : i32 to vector<16x128xi32>
    %347 = arith.cmpi eq, %271, %346 : vector<16x128xi32>
    %c1_i32_109 = arith.constant 1 : i32
    %348 = vector.broadcast %c1_i32_109 : i32 to vector<16x128xi32>
    %349 = arith.cmpi eq, %287, %348 : vector<16x128xi32>
    %350 = arith.andi %347, %349 : vector<16x128xi1>
    %351 = arith.extui %350 : vector<16x128xi1> to vector<16x128xi32>
    %352 = arith.sitofp %351 : vector<16x128xi32> to vector<16x128xf32>
    %353 = vector.extract_strided_slice %253 {offsets = [0, 4], sizes = [26, 124], strides = [1, 1]} : vector<26x128xf32> to vector<26x124xf32>
    %354 = vector.extract_strided_slice %253 {offsets = [0, 0], sizes = [26, 4], strides = [1, 1]} : vector<26x128xf32> to vector<26x4xf32>
    %355 = tpu.concatenate %353, %354 in 1 : vector<26x124xf32>, vector<26x4xf32> -> vector<26x128xf32>
    %356 = vector.extract_strided_slice %253 {offsets = [0, 5], sizes = [26, 123], strides = [1, 1]} : vector<26x128xf32> to vector<26x123xf32>
    %357 = vector.extract_strided_slice %253 {offsets = [0, 0], sizes = [26, 5], strides = [1, 1]} : vector<26x128xf32> to vector<26x5xf32>
    %358 = tpu.concatenate %356, %357 in 1 : vector<26x123xf32>, vector<26x5xf32> -> vector<26x128xf32>
    %359 = vector.extract_strided_slice %253 {offsets = [0, 6], sizes = [26, 122], strides = [1, 1]} : vector<26x128xf32> to vector<26x122xf32>
    %360 = vector.extract_strided_slice %253 {offsets = [0, 0], sizes = [26, 6], strides = [1, 1]} : vector<26x128xf32> to vector<26x6xf32>
    %361 = tpu.concatenate %359, %360 in 1 : vector<26x122xf32>, vector<26x6xf32> -> vector<26x128xf32>
    %cst_110 = arith.constant 0.000000e+00 : f32
    %362 = vector.broadcast %cst_110 : f32 to vector<16x128xf32>
    %363 = vector.extract_strided_slice %355 {offsets = [4, 0], sizes = [16, 128], strides = [1, 1]} : vector<26x128xf32> to vector<16x128xf32>
    %364 = arith.mulf %294, %363 : vector<16x128xf32>
    %cst_111 = arith.constant 2.500000e-01 : f32
    %365 = vector.broadcast %cst_111 : f32 to vector<16x128xf32>
    %366 = arith.mulf %365, %364 : vector<16x128xf32>
    %367 = arith.addf %362, %366 : vector<16x128xf32>
    %368 = vector.extract_strided_slice %355 {offsets = [5, 0], sizes = [16, 128], strides = [1, 1]} : vector<26x128xf32> to vector<16x128xf32>
    %369 = arith.mulf %308, %368 : vector<16x128xf32>
    %cst_112 = arith.constant 5.000000e-01 : f32
    %370 = vector.broadcast %cst_112 : f32 to vector<16x128xf32>
    %371 = arith.mulf %370, %369 : vector<16x128xf32>
    %372 = arith.addf %367, %371 : vector<16x128xf32>
    %373 = vector.extract_strided_slice %355 {offsets = [6, 0], sizes = [16, 128], strides = [1, 1]} : vector<26x128xf32> to vector<16x128xf32>
    %374 = arith.mulf %294, %373 : vector<16x128xf32>
    %cst_113 = arith.constant 2.500000e-01 : f32
    %375 = vector.broadcast %cst_113 : f32 to vector<16x128xf32>
    %376 = arith.mulf %375, %374 : vector<16x128xf32>
    %377 = arith.addf %372, %376 : vector<16x128xf32>
    %378 = vector.extract_strided_slice %358 {offsets = [4, 0], sizes = [16, 128], strides = [1, 1]} : vector<26x128xf32> to vector<16x128xf32>
    %379 = arith.mulf %301, %378 : vector<16x128xf32>
    %cst_114 = arith.constant 5.000000e-01 : f32
    %380 = vector.broadcast %cst_114 : f32 to vector<16x128xf32>
    %381 = arith.mulf %380, %379 : vector<16x128xf32>
    %382 = arith.addf %377, %381 : vector<16x128xf32>
    %383 = vector.extract_strided_slice %358 {offsets = [5, 0], sizes = [16, 128], strides = [1, 1]} : vector<26x128xf32> to vector<16x128xf32>
    %384 = arith.mulf %315, %383 : vector<16x128xf32>
    %cst_115 = arith.constant 1.000000e+00 : f32
    %385 = vector.broadcast %cst_115 : f32 to vector<16x128xf32>
    %386 = arith.mulf %385, %384 : vector<16x128xf32>
    %387 = arith.addf %382, %386 : vector<16x128xf32>
    %388 = vector.extract_strided_slice %358 {offsets = [6, 0], sizes = [16, 128], strides = [1, 1]} : vector<26x128xf32> to vector<16x128xf32>
    %389 = arith.mulf %301, %388 : vector<16x128xf32>
    %cst_116 = arith.constant 5.000000e-01 : f32
    %390 = vector.broadcast %cst_116 : f32 to vector<16x128xf32>
    %391 = arith.mulf %390, %389 : vector<16x128xf32>
    %392 = arith.addf %387, %391 : vector<16x128xf32>
    %393 = vector.extract_strided_slice %361 {offsets = [4, 0], sizes = [16, 128], strides = [1, 1]} : vector<26x128xf32> to vector<16x128xf32>
    %394 = arith.mulf %294, %393 : vector<16x128xf32>
    %cst_117 = arith.constant 2.500000e-01 : f32
    %395 = vector.broadcast %cst_117 : f32 to vector<16x128xf32>
    %396 = arith.mulf %395, %394 : vector<16x128xf32>
    %397 = arith.addf %392, %396 : vector<16x128xf32>
    %398 = vector.extract_strided_slice %361 {offsets = [5, 0], sizes = [16, 128], strides = [1, 1]} : vector<26x128xf32> to vector<16x128xf32>
    %399 = arith.mulf %308, %398 : vector<16x128xf32>
    %cst_118 = arith.constant 5.000000e-01 : f32
    %400 = vector.broadcast %cst_118 : f32 to vector<16x128xf32>
    %401 = arith.mulf %400, %399 : vector<16x128xf32>
    %402 = arith.addf %397, %401 : vector<16x128xf32>
    %403 = vector.extract_strided_slice %361 {offsets = [6, 0], sizes = [16, 128], strides = [1, 1]} : vector<26x128xf32> to vector<16x128xf32>
    %404 = arith.mulf %294, %403 : vector<16x128xf32>
    %cst_119 = arith.constant 2.500000e-01 : f32
    %405 = vector.broadcast %cst_119 : f32 to vector<16x128xf32>
    %406 = arith.mulf %405, %404 : vector<16x128xf32>
    %407 = arith.addf %402, %406 : vector<16x128xf32>
    %cst_120 = arith.constant 0.000000e+00 : f32
    %cst_121 = arith.constant 1.000000e+00 : f32
    %408 = vector.broadcast %cst_120 : f32 to vector<16x128xf32>
    %409 = arith.maximumf %408, %407 : vector<16x128xf32>
    %410 = vector.broadcast %cst_121 : f32 to vector<16x128xf32>
    %411 = arith.minimumf %410, %409 : vector<16x128xf32>
    %cst_122 = arith.constant 1.292000e+01 : f32
    %412 = vector.broadcast %cst_122 : f32 to vector<16x128xf32>
    %413 = arith.mulf %412, %411 : vector<16x128xf32>
    %cst_123 = arith.constant 9.99999993E-9 : f32
    %414 = vector.broadcast %cst_123 : f32 to vector<16x128xf32>
    %415 = arith.maximumf %411, %414 : vector<16x128xf32>
    %416 = math.log %415 : vector<16x128xf32>
    %cst_124 = arith.constant 2.400000e+00 : f32
    %417 = vector.broadcast %cst_124 : f32 to vector<16x128xf32>
    %418 = arith.divf %416, %417 : vector<16x128xf32>
    %419 = math.exp %418 : vector<16x128xf32>
    %cst_125 = arith.constant 1.055000e+00 : f32
    %420 = vector.broadcast %cst_125 : f32 to vector<16x128xf32>
    %421 = arith.mulf %420, %419 : vector<16x128xf32>
    %cst_126 = arith.constant 5.500000e-02 : f32
    %422 = vector.broadcast %cst_126 : f32 to vector<16x128xf32>
    %423 = arith.subf %421, %422 : vector<16x128xf32>
    %cst_127 = arith.constant 3.130800e-03 : f32
    %424 = vector.broadcast %cst_127 : f32 to vector<16x128xf32>
    %425 = arith.cmpf ole, %411, %424 : vector<16x128xf32>
    %426 = arith.select %425, %413, %423 : vector<16x128xi1>, vector<16x128xf32>
    %427 = vector.extract_strided_slice %426 {offsets = [0, 0], sizes = [16, 16], strides = [1, 1]} : vector<16x128xf32> to vector<16x16xf32>
    %c0_128 = arith.constant 0 : index
    %c0_129 = arith.constant 0 : index
    %c0_130 = arith.constant 0 : index
    %c0_131 = arith.constant 0 : index
    %428 = vector.load %arg3[%c0_128, %c0_129, %c0_130, %c0_131] : memref<1x3x16x16xf32, #tpu.memory_space<vmem>>, vector<1x1x16x16xf32>
    %429 = vector.shape_cast %428 : vector<1x1x16x16xf32> to vector<16x16xf32>
    %430 = vector.shape_cast %427 : vector<16x16xf32> to vector<1x1x16x16xf32>
    tpu.vector_store %arg3[%c0_128, %c0_129, %c0_130, %c0_131], %430 {strides = array<i32>} : memref<1x3x16x16xf32, #tpu.memory_space<vmem>>, vector<1x1x16x16xf32>,
    %cst_132 = arith.constant 0.000000e+00 : f32
    %431 = vector.broadcast %cst_132 : f32 to vector<16x128xf32>
    %432 = vector.extract_strided_slice %355 {offsets = [5, 0], sizes = [16, 128], strides = [1, 1]} : vector<26x128xf32> to vector<16x128xf32>
    %433 = arith.mulf %321, %432 : vector<16x128xf32>
    %cst_133 = arith.constant 2.500000e-01 : f32
    %434 = vector.broadcast %cst_133 : f32 to vector<16x128xf32>
    %435 = arith.mulf %434, %433 : vector<16x128xf32>
    %436 = arith.addf %431, %435 : vector<16x128xf32>
    %437 = vector.extract_strided_slice %358 {offsets = [4, 0], sizes = [16, 128], strides = [1, 1]} : vector<26x128xf32> to vector<16x128xf32>
    %438 = arith.mulf %318, %437 : vector<16x128xf32>
    %cst_134 = arith.constant 2.500000e-01 : f32
    %439 = vector.broadcast %cst_134 : f32 to vector<16x128xf32>
    %440 = arith.mulf %439, %438 : vector<16x128xf32>
    %441 = arith.addf %436, %440 : vector<16x128xf32>
    %442 = vector.extract_strided_slice %358 {offsets = [5, 0], sizes = [16, 128], strides = [1, 1]} : vector<26x128xf32> to vector<16x128xf32>
    %443 = arith.mulf %324, %442 : vector<16x128xf32>
    %cst_135 = arith.constant 1.000000e+00 : f32
    %444 = vector.broadcast %cst_135 : f32 to vector<16x128xf32>
    %445 = arith.mulf %444, %443 : vector<16x128xf32>
    %446 = arith.addf %441, %445 : vector<16x128xf32>
    %447 = vector.extract_strided_slice %358 {offsets = [6, 0], sizes = [16, 128], strides = [1, 1]} : vector<26x128xf32> to vector<16x128xf32>
    %448 = arith.mulf %318, %447 : vector<16x128xf32>
    %cst_136 = arith.constant 2.500000e-01 : f32
    %449 = vector.broadcast %cst_136 : f32 to vector<16x128xf32>
    %450 = arith.mulf %449, %448 : vector<16x128xf32>
    %451 = arith.addf %446, %450 : vector<16x128xf32>
    %452 = vector.extract_strided_slice %361 {offsets = [5, 0], sizes = [16, 128], strides = [1, 1]} : vector<26x128xf32> to vector<16x128xf32>
    %453 = arith.mulf %321, %452 : vector<16x128xf32>
    %cst_137 = arith.constant 2.500000e-01 : f32
    %454 = vector.broadcast %cst_137 : f32 to vector<16x128xf32>
    %455 = arith.mulf %454, %453 : vector<16x128xf32>
    %456 = arith.addf %451, %455 : vector<16x128xf32>
    %cst_138 = arith.constant 0.000000e+00 : f32
    %cst_139 = arith.constant 1.000000e+00 : f32
    %457 = vector.broadcast %cst_138 : f32 to vector<16x128xf32>
    %458 = arith.maximumf %457, %456 : vector<16x128xf32>
    %459 = vector.broadcast %cst_139 : f32 to vector<16x128xf32>
    %460 = arith.minimumf %459, %458 : vector<16x128xf32>
    %cst_140 = arith.constant 1.292000e+01 : f32
    %461 = vector.broadcast %cst_140 : f32 to vector<16x128xf32>
    %462 = arith.mulf %461, %460 : vector<16x128xf32>
    %cst_141 = arith.constant 9.99999993E-9 : f32
    %463 = vector.broadcast %cst_141 : f32 to vector<16x128xf32>
    %464 = arith.maximumf %460, %463 : vector<16x128xf32>
    %465 = math.log %464 : vector<16x128xf32>
    %cst_142 = arith.constant 2.400000e+00 : f32
    %466 = vector.broadcast %cst_142 : f32 to vector<16x128xf32>
    %467 = arith.divf %465, %466 : vector<16x128xf32>
    %468 = math.exp %467 : vector<16x128xf32>
    %cst_143 = arith.constant 1.055000e+00 : f32
    %469 = vector.broadcast %cst_143 : f32 to vector<16x128xf32>
    %470 = arith.mulf %469, %468 : vector<16x128xf32>
    %cst_144 = arith.constant 5.500000e-02 : f32
    %471 = vector.broadcast %cst_144 : f32 to vector<16x128xf32>
    %472 = arith.subf %470, %471 : vector<16x128xf32>
    %cst_145 = arith.constant 3.130800e-03 : f32
    %473 = vector.broadcast %cst_145 : f32 to vector<16x128xf32>
    %474 = arith.cmpf ole, %460, %473 : vector<16x128xf32>
    %475 = arith.select %474, %462, %472 : vector<16x128xi1>, vector<16x128xf32>
    %476 = vector.extract_strided_slice %475 {offsets = [0, 0], sizes = [16, 16], strides = [1, 1]} : vector<16x128xf32> to vector<16x16xf32>
    %c0_146 = arith.constant 0 : index
    %c1_147 = arith.constant 1 : index
    %c0_148 = arith.constant 0 : index
    %c0_149 = arith.constant 0 : index
    %477 = vector.load %arg3[%c0_146, %c1_147, %c0_148, %c0_149] : memref<1x3x16x16xf32, #tpu.memory_space<vmem>>, vector<1x1x16x16xf32>
    %478 = vector.shape_cast %477 : vector<1x1x16x16xf32> to vector<16x16xf32>
    %479 = vector.shape_cast %476 : vector<16x16xf32> to vector<1x1x16x16xf32>
    tpu.vector_store %arg3[%c0_146, %c1_147, %c0_148, %c0_149], %479 {strides = array<i32>} : memref<1x3x16x16xf32, #tpu.memory_space<vmem>>, vector<1x1x16x16xf32>,
    %cst_150 = arith.constant 0.000000e+00 : f32
    %480 = vector.broadcast %cst_150 : f32 to vector<16x128xf32>
    %481 = vector.extract_strided_slice %355 {offsets = [4, 0], sizes = [16, 128], strides = [1, 1]} : vector<26x128xf32> to vector<16x128xf32>
    %482 = arith.mulf %331, %481 : vector<16x128xf32>
    %cst_151 = arith.constant 2.500000e-01 : f32
    %483 = vector.broadcast %cst_151 : f32 to vector<16x128xf32>
    %484 = arith.mulf %483, %482 : vector<16x128xf32>
    %485 = arith.addf %480, %484 : vector<16x128xf32>
    %486 = vector.extract_strided_slice %355 {offsets = [5, 0], sizes = [16, 128], strides = [1, 1]} : vector<26x128xf32> to vector<16x128xf32>
    %487 = arith.mulf %345, %486 : vector<16x128xf32>
    %cst_152 = arith.constant 5.000000e-01 : f32
    %488 = vector.broadcast %cst_152 : f32 to vector<16x128xf32>
    %489 = arith.mulf %488, %487 : vector<16x128xf32>
    %490 = arith.addf %485, %489 : vector<16x128xf32>
    %491 = vector.extract_strided_slice %355 {offsets = [6, 0], sizes = [16, 128], strides = [1, 1]} : vector<26x128xf32> to vector<16x128xf32>
    %492 = arith.mulf %331, %491 : vector<16x128xf32>
    %cst_153 = arith.constant 2.500000e-01 : f32
    %493 = vector.broadcast %cst_153 : f32 to vector<16x128xf32>
    %494 = arith.mulf %493, %492 : vector<16x128xf32>
    %495 = arith.addf %490, %494 : vector<16x128xf32>
    %496 = vector.extract_strided_slice %358 {offsets = [4, 0], sizes = [16, 128], strides = [1, 1]} : vector<26x128xf32> to vector<16x128xf32>
    %497 = arith.mulf %338, %496 : vector<16x128xf32>
    %cst_154 = arith.constant 5.000000e-01 : f32
    %498 = vector.broadcast %cst_154 : f32 to vector<16x128xf32>
    %499 = arith.mulf %498, %497 : vector<16x128xf32>
    %500 = arith.addf %495, %499 : vector<16x128xf32>
    %501 = vector.extract_strided_slice %358 {offsets = [5, 0], sizes = [16, 128], strides = [1, 1]} : vector<26x128xf32> to vector<16x128xf32>
    %502 = arith.mulf %352, %501 : vector<16x128xf32>
    %cst_155 = arith.constant 1.000000e+00 : f32
    %503 = vector.broadcast %cst_155 : f32 to vector<16x128xf32>
    %504 = arith.mulf %503, %502 : vector<16x128xf32>
    %505 = arith.addf %500, %504 : vector<16x128xf32>
    %506 = vector.extract_strided_slice %358 {offsets = [6, 0], sizes = [16, 128], strides = [1, 1]} : vector<26x128xf32> to vector<16x128xf32>
    %507 = arith.mulf %338, %506 : vector<16x128xf32>
    %cst_156 = arith.constant 5.000000e-01 : f32
    %508 = vector.broadcast %cst_156 : f32 to vector<16x128xf32>
    %509 = arith.mulf %508, %507 : vector<16x128xf32>
    %510 = arith.addf %505, %509 : vector<16x128xf32>
    %511 = vector.extract_strided_slice %361 {offsets = [4, 0], sizes = [16, 128], strides = [1, 1]} : vector<26x128xf32> to vector<16x128xf32>
    %512 = arith.mulf %331, %511 : vector<16x128xf32>
    %cst_157 = arith.constant 2.500000e-01 : f32
    %513 = vector.broadcast %cst_157 : f32 to vector<16x128xf32>
    %514 = arith.mulf %513, %512 : vector<16x128xf32>
    %515 = arith.addf %510, %514 : vector<16x128xf32>
    %516 = vector.extract_strided_slice %361 {offsets = [5, 0], sizes = [16, 128], strides = [1, 1]} : vector<26x128xf32> to vector<16x128xf32>
    %517 = arith.mulf %345, %516 : vector<16x128xf32>
    %cst_158 = arith.constant 5.000000e-01 : f32
    %518 = vector.broadcast %cst_158 : f32 to vector<16x128xf32>
    %519 = arith.mulf %518, %517 : vector<16x128xf32>
    %520 = arith.addf %515, %519 : vector<16x128xf32>
    %521 = vector.extract_strided_slice %361 {offsets = [6, 0], sizes = [16, 128], strides = [1, 1]} : vector<26x128xf32> to vector<16x128xf32>
    %522 = arith.mulf %331, %521 : vector<16x128xf32>
    %cst_159 = arith.constant 2.500000e-01 : f32
    %523 = vector.broadcast %cst_159 : f32 to vector<16x128xf32>
    %524 = arith.mulf %523, %522 : vector<16x128xf32>
    %525 = arith.addf %520, %524 : vector<16x128xf32>
    %cst_160 = arith.constant 0.000000e+00 : f32
    %cst_161 = arith.constant 1.000000e+00 : f32
    %526 = vector.broadcast %cst_160 : f32 to vector<16x128xf32>
    %527 = arith.maximumf %526, %525 : vector<16x128xf32>
    %528 = vector.broadcast %cst_161 : f32 to vector<16x128xf32>
    %529 = arith.minimumf %528, %527 : vector<16x128xf32>
    %cst_162 = arith.constant 1.292000e+01 : f32
    %530 = vector.broadcast %cst_162 : f32 to vector<16x128xf32>
    %531 = arith.mulf %530, %529 : vector<16x128xf32>
    %cst_163 = arith.constant 9.99999993E-9 : f32
    %532 = vector.broadcast %cst_163 : f32 to vector<16x128xf32>
    %533 = arith.maximumf %529, %532 : vector<16x128xf32>
    %534 = math.log %533 : vector<16x128xf32>
    %cst_164 = arith.constant 2.400000e+00 : f32
    %535 = vector.broadcast %cst_164 : f32 to vector<16x128xf32>
    %536 = arith.divf %534, %535 : vector<16x128xf32>
    %537 = math.exp %536 : vector<16x128xf32>
    %cst_165 = arith.constant 1.055000e+00 : f32
    %538 = vector.broadcast %cst_165 : f32 to vector<16x128xf32>
    %539 = arith.mulf %538, %537 : vector<16x128xf32>
    %cst_166 = arith.constant 5.500000e-02 : f32
    %540 = vector.broadcast %cst_166 : f32 to vector<16x128xf32>
    %541 = arith.subf %539, %540 : vector<16x128xf32>
    %cst_167 = arith.constant 3.130800e-03 : f32
    %542 = vector.broadcast %cst_167 : f32 to vector<16x128xf32>
    %543 = arith.cmpf ole, %529, %542 : vector<16x128xf32>
    %544 = arith.select %543, %531, %541 : vector<16x128xi1>, vector<16x128xf32>
    %545 = vector.extract_strided_slice %544 {offsets = [0, 0], sizes = [16, 16], strides = [1, 1]} : vector<16x128xf32> to vector<16x16xf32>
    %c0_168 = arith.constant 0 : index
    %c2_169 = arith.constant 2 : index
    %c0_170 = arith.constant 0 : index
    %c0_171 = arith.constant 0 : index
    %546 = vector.load %arg3[%c0_168, %c2_169, %c0_170, %c0_171] : memref<1x3x16x16xf32, #tpu.memory_space<vmem>>, vector<1x1x16x16xf32>
    %547 = vector.shape_cast %546 : vector<1x1x16x16xf32> to vector<16x16xf32>
    %548 = vector.shape_cast %545 : vector<16x16xf32> to vector<1x1x16x16xf32>
    tpu.vector_store %arg3[%c0_168, %c2_169, %c0_170, %c0_171], %548 {strides = array<i32>} : memref<1x3x16x16xf32, #tpu.memory_space<vmem>>, vector<1x1x16x16xf32>,
    return
  }
  func.func @transform_0(%arg0: i32) -> (i32, i32, i32, i32) {
    %c0_i32 = arith.constant 0 : i32
    %c0_i32_0 = arith.constant 0 : i32
    %c0_i32_1 = arith.constant 0 : i32
    %c0_i32_2 = arith.constant 0 : i32
    return %arg0, %c0_i32, %c0_i32_0, %c0_i32_1 : i32, i32, i32, i32
  }
  func.func @transform_1(%arg0: i32) -> (i32, i32, i32) {
    %c0_i32 = arith.constant 0 : i32
    %c0_i32_0 = arith.constant 0 : i32
    %c0_i32_1 = arith.constant 0 : i32
    return %arg0, %c0_i32, %c0_i32_0 : i32, i32, i32
  }
  func.func @transform_2(%arg0: i32) -> (i32, i32, i32, i32) {
    %c0_i32 = arith.constant 0 : i32
    %c0_i32_0 = arith.constant 0 : i32
    %c0_i32_1 = arith.constant 0 : i32
    %c0_i32_2 = arith.constant 0 : i32
    return %arg0, %c0_i32, %c0_i32_0, %c0_i32_1 : i32, i32, i32, i32
  }
}

</mosaic_0001>

<bundles_post_ra>
// kernel: depth_estimator_forward.11
= control target key start
LH: loop header
LB: loop body
LE: loop exit
PB: predicated region body
PF: predicated region fallthrough
CT: control target
= control target key end

     0   :  { %7 = vsyncpa [#allocation3], 0  ;;  %s2753_s0 = inlined_call_operand.vmem [shape: f32[2,3,30,128], index: 0, kind: input, shape index: {}]   ;;  %s2754_s1 = inlined_call_operand.vmem [shape: f32[2,26,128], index: 1, kind: input, shape index: {}]   ;;  %s2755_s2 = inlined_call_operand.hbm [shape: f32[2,3,16,16], index: 2, kind: output, shape index: {}]  }
   0x1   :  { %9 = vsyncpa [#allocation3 + $0x1], 0  ;;  %s1708_s9 = smov 0   ;;  %s1710_s10 = smov 0  }
   0x2   :  { %s1712_s11 = smov 0   ;;  %s1714_s12 = smov 0  }
   0x3 LB: > { %s1729_s13 = sadd.s32 4294967295, %s1680_s12   ;;  %s1434_s14 = sadd.s32 4294967294, %s1680_s12   ;;  %s1680_s12 = sphi %s1714_s12, %s2820_s12   ;;  %s1676_s11 = sphi %s1712_s11, %s2819_s11   ;;  %s1672_s10 = sphi %s1710_s10, %s2818_s10   ;;  %s1668_s9 = sphi %s1708_s9, %s2817_s9  }
   0x4   : > { %s1733_s15 = sadd.s32 1, %s1680_s12   ;;  %s74_s16 = sadd.s32 1, %s1676_s11 }
   0x5   : > { %s71_s17 = ssub.s32 %s1680_s12, %s1733_s15  ;;  %p84_p0 = scmp.ne.s32.totalorder %s1676_s11, %s1672_s10 }
   0x6   : > { %p72_p1 = scmp.eq.s32.totalorder %s71_s17, 0  ;;  %p85_p2 = scmp.eq.s32.totalorder %s1729_s13, 1 }
   0x7   : > { %p90_p3 = scmp.ne.s32.totalorder %s1672_s10, %s1668_s9  ;;  %p91_p4 = scmp.eq.s32.totalorder %s1434_s14, 1 }
   0x8   : > { %s1744_s18 = scalar_select %p72_p1, %s1676_s11, %s74_s16  }
   0x9   : > { %p1746_p5 = por %p85_p2, %p84_p0  ;;  %p1750_p6 = por %p91_p4, %p90_p3 }
   0xa   : > { %p1437_p7 = scmp.ge.s32.totalorder %s1680_s12, 1  ;;  %p125_p8 = scmp.lt.s32.totalorder %s1680_s12, 3 }
   0xc   : > { %p126_p9 = pnand %p1437_p7, %p125_p8 }
   0xd   : > { %p152_p10 = scmp.lt.s32.totalorder (!%p126_p9), %s1729_s13, 1  ;;  %s1682_s26 = smov (!%p126_p9), 1  }
   0xe   : > { %129 = sbr.rel (%p126_p9) target bundleno = 526 (0x20e), region = 28  ;;  %s1683_s27 = smov (!%p126_p9), 127  }
   0xf   : > { %s1684_s28 = smov (!%p126_p9), 126   ;;  %s1685_s29 = smov (!%p126_p9), 125  }
  0x10   : > { %s1687_s6 = smov (!%p126_p9), 124   ;;  %s1688_s7 = smov (!%p126_p9), 123  }
  0x11   : > { %s1689_s8 = smov (!%p126_p9), 122   ;;  %s149_s14 = sand.u32 (!%p126_p9), 1, %s1672_s10  }
  0x12   : > { %s1494_s16 = smul.u32 (!%p126_p9), 48, %s149_s14 }
  0x14   : > { %s2677_s17 = scalar_lea.vmem (!%p126_p9), [#allocation2], %s1494_s16 }
  0x15   : > { %s1758_s21 = scalar_select %p152_p10, %s1729_s13, 1 }
  0x17   : > { %s1495_s22 = smul.u32 96, %s1758_s21  ;;  %s1493_s30 = sshll.u32 %s1758_s21, 5 }
  0x18   : > { %s2266_s5 = scalar_lea.vmem %s2754_s1, %s1493_s30  ;;  %s1496_s21 = smul.u32 768, %s1729_s13 }
  0x19   : > { %s1764_s25 = scalar_lea.vmem %s2753_s0, %s1495_s22  ;;  %s1360_s22 = sshll.u32 %s2677_s17, 4  ;;  %s2706_s22 = int_to_ptr.vmem [resolvable:$true] %s1360_s22 }
  0x1a   : > { %v1767_v0 = vld [vmem:[%s1764_s25 + $0x10] sm:$0xff]  ;;  %v1770_v1 = vld [vmem:[%s1764_s25] sm:$0xff]  ;;  %v1773_v2 = vld [vmem:[%s1764_s25 + $0x18] sm:$0x3f]  ;;  %s2703_s24 = scalar_lea.hbm %s2755_s2, %s1496_s21 }
  0x1b   : > { %v239_v3 = vadd.f32 0.055, %v1767_v0  ;;  %v237_v4 = vadd.f32 0.055, %v1770_v1  ;;  %v240_v6 = vadd.f32 0.055, %v1773_v2 }
  0x1c   : > { %v1779_v8 = vld [vmem:[%s1764_s25 + $0x8] sm:$0xff]  ;;  %v1787_v17 = vld [vmem:[%s1764_s25 + $0x20] sm:$0xff]  ;;  %v1791_v21 = vld [vmem:[%s1764_s25 + $0x38] sm:$0x3f]  ;;  %vm272_vm0 = vcmp.le.f32.partialorder %v1767_v0, 0.04045 }
  0x1d   : > { %v244_v5 = vmul.f32 0.94786733, %v239_v3  ;;  %v242_v7 = vmul.f32 0.94786733, %v237_v4  ;;  %v1782_v9 = vld [vmem:[%s1764_s25 + $0x28] sm:$0xff]  ;;  %v1794_v22 = vld [vmem:[%s1764_s25 + $0x30] sm:$0xff] }
  0x1e   : > { %v245_v11 = vmul.f32 0.94786733, %v240_v6  ;;  %v238_v13 = vadd.f32 0.055, %v1779_v8  ;;  %v472_v15 = vadd.f32 0.055, %v1782_v9 }
  0x1f   : > { %v248_v10 = vmax.f32 %v244_v5, 1e-08  ;;  %v246_v12 = vmax.f32 %v242_v7, 1e-08  ;;  %v471_v19 = vadd.f32 0.055, %v1787_v17 }
  0x20   : > { %v249_v14 = vmax.f32 %v245_v11, 1e-08  ;;  %v243_v16 = vmul.f32 0.94786733, %v238_v13  ;;  %v476_v18 = vmul.f32 0.94786733, %v472_v15 }
  0x21   : > { %1546 = vlog2.f32 %v248_v10  ;;  %v475_v24 = vmul.f32 0.94786733, %v471_v19  ;;  %v474_v25 = vadd.f32 0.055, %v1791_v21  ;;  %v473_v27 = vadd.f32 0.055, %v1794_v22 }
  0x22   : > { %1548 = vlog2.f32 %v246_v12  ;;  %v247_v20 = vmax.f32 %v243_v16, 1e-08  ;;  %v480_v23 = vmax.f32 %v476_v18, 1e-08  ;;  %v1799_v29 = vld [vmem:[%s1764_s25 + $0x48] sm:$0xff]  ;;  %v1802_v30 = vld [vmem:[%s1764_s25 + $0x40] sm:$0xff] }
  0x23   : > { %1550 = vlog2.f32 %v249_v14  ;;  %v479_v26 = vmax.f32 %v475_v24, 1e-08  ;;  %v478_v28 = vmul.f32 0.94786733, %v474_v25  ;;  %v477_v31 = vmul.f32 0.94786733, %v473_v27 }
  0x24   : > { %1552 = vlog2.f32 %v247_v20  ;;  %v701_v32 = vadd.f32 0.055, %v1799_v29  ;;  %v1806_v34 = vld [vmem:[%s1764_s25 + $0x58] sm:$0x3f]  ;;  %v700_v38 = vadd.f32 0.055, %v1802_v30 }
  0x25   : > { %1554 = vlog2.f32 %v480_v23  ;;  %v482_v33 = vmax.f32 %v478_v28, 1e-08  ;;  %v481_v36 = vmax.f32 %v477_v31, 1e-08  ;;  %v703_v47 = vadd.f32 0.055, %v1806_v34 }
  0x26   : > { %1556 = vlog2.f32 %v479_v26  ;;  %v705_v37 = vmul.f32 0.94786733, %v701_v32  ;;  %v704_v44 = vmul.f32 0.94786733, %v700_v38  ;;  %v1811_v57 = vld [vmem:[%s1764_s25 + $0x50] sm:$0xff]  ;;  %s2712_s25 = scalar_lea.sflag [#allocation3], %s149_s14 }
  0x27   : > { %1558 = vlog2.f32 %v482_v33  ;;  %v707_v53 = vmul.f32 0.94786733, %v703_v47  ;;  %v702_v63 = vadd.f32 0.055, %v1811_v57  ;;  %v235_v18 = vmul.f32 0.07739938, %v1767_v0 }
  0x28   : > { %1560 = vlog2.f32 %v481_v36  ;;  %v709_v43 = vmax.f32 %v705_v37, 1e-08  ;;  %v708_v49 = vmax.f32 %v704_v44, 1e-08  ;;  %v233_v20 = vmul.f32 0.07739938, %v1770_v1 }
  0x29   : > { %v711_v60 = vmax.f32 %v707_v53, 1e-08  ;;  %v706_v6 = vmul.f32 0.94786733, %v702_v63  ;;  %vm270_vm1 = vcmp.le.f32.partialorder %v1770_v1, 0.04045 }
  0x2a   : > { %1562 = vlog2.f32 %v709_v43  ;;  %v236_v25 = vmul.f32 0.07739938, %v1773_v2  ;;  %vm273_vm2 = vcmp.le.f32.partialorder %v1773_v2, 0.04045  ;;  %v234_v1 = vmul.f32 0.07739938, %v1779_v8 }
  0x2b   : > { %v1547_v35 = vpop.eup %1546  ;;  %v710_v14 = vmax.f32 %v706_v6, 1e-08  ;;  %vm271_vm3 = vcmp.le.f32.partialorder %v1779_v8, 0.04045  ;;  %v468_v36 = vmul.f32 0.07739938, %v1782_v9 }
  0x2c   : > { %v1549_v39 = vpop.eup %1548  ;;  %v255_v40 = vmul.f32 0.6931472, %v1547_v35  ;;  %vm504_vm4 = vcmp.le.f32.partialorder %v1782_v9, 0.04045  ;;  %vm503_vm5 = vcmp.le.f32.partialorder %v1787_v17, 0.04045 }
  0x2d   : > { %v1551_v41 = vpop.eup %1550  ;;  %v251_v42 = vmul.f32 0.6931472, %v1549_v39  ;;  %v467_v39 = vmul.f32 0.07739938, %v1787_v17  ;;  %vm506_vm6 = vcmp.le.f32.partialorder %v1791_v21, 0.04045 }
  0x2e   : > { %v260_v45 = vmul.f32 2.4, %v255_v40  ;;  %v257_v46 = vmul.f32 0.6931472, %v1551_v41  ;;  %v1553_v50 = vpop.eup %1552  ;;  %v469_v47 = vmul.f32 0.07739938, %v1794_v22 }
  0x2f   : > { %v258_v48 = vmul.f32 2.4, %v251_v42  ;;  %v1555_v54 = vpop.eup %1554  ;;  %v253_v56 = vmul.f32 0.6931472, %v1553_v50  ;;  %vm505_vm7 = vcmp.le.f32.partialorder %v1794_v22, 0.04045 }
  0x30   : > { %v266_v51 = vmul.f32 1.442695, %v260_v45  ;;  %v261_v52 = vmul.f32 2.4, %v257_v46  ;;  %v486_v59 = vmul.f32 0.6931472, %v1555_v54  ;;  %v1557_v61 = vpop.eup %1556 }
  0x31   : > { %v262_v55 = vmul.f32 1.442695, %v258_v48  ;;  %v259_v62 = vmul.f32 2.4, %v253_v56  ;;  %v484_v4 = vmul.f32 0.6931472, %v1557_v61  ;;  %v1559_v7 = vpop.eup %1558 }
  0x32   : > { %1564 = vpow2.f32 %v266_v51  ;;  %v268_v58 = vmul.f32 1.442695, %v261_v52  ;;  %v492_v3 = vmul.f32 2.4, %v486_v59  ;;  %v1561_v12 = vpop.eup %1560  ;;  %v490_v13 = vmul.f32 0.6931472, %v1559_v7 }
  0x33   : > { %1566 = vpow2.f32 %v262_v55  ;;  %v264_v5 = vmul.f32 1.442695, %v259_v62  ;;  %v491_v11 = vmul.f32 2.4, %v484_v4  ;;  %v488_v16 = vmul.f32 0.6931472, %v1561_v12 }
  0x34   : > { %1568 = vpow2.f32 %v268_v58  ;;  %v497_v10 = vmul.f32 1.442695, %v492_v3  ;;  %v494_v19 = vmul.f32 2.4, %v490_v13  ;;  %v1563_v24 = vpop.eup %1562  ;;  %v470_v45 = vmul.f32 0.07739938, %v1791_v21 }
  0x35   : > { %1570 = vlog2.f32 %v708_v49  ;;  %v495_v15 = vmul.f32 1.442695, %v491_v11  ;;  %v493_v23 = vmul.f32 2.4, %v488_v16  ;;  %v715_v42 = vmul.f32 0.6931472, %v1563_v24 }
  0x36   : > { %1572 = vlog2.f32 %v711_v60  ;;  %v501_v26 = vmul.f32 1.442695, %v494_v19  ;;  %v697_v60 = vmul.f32 0.07739938, %v1799_v29  ;;  %vm733_vm8 = vcmp.le.f32.partialorder %v1799_v29, 0.04045 }
  0x37   : > { %1574 = vpow2.f32 %v264_v5  ;;  %v499_v28 = vmul.f32 1.442695, %v493_v23  ;;  %v721_v17 = vmul.f32 2.4, %v715_v42  ;;  %v696_v62 = vmul.f32 0.07739938, %v1802_v30 }
  0x38   : > { %1576 = vpow2.f32 %v497_v10  ;;  %vm732_vm9 = vcmp.le.f32.partialorder %v1802_v30, 0.04045  ;;  %v699_v4 = vmul.f32 0.07739938, %v1806_v34  ;;  %vm735_vm10 = vcmp.le.f32.partialorder %v1806_v34, 0.04045 }
  0x39   : > { %1578 = vlog2.f32 %v710_v14  ;;  %v726_v21 = vmul.f32 1.442695, %v721_v17  ;;  %v698_v29 = vmul.f32 0.07739938, %v1811_v57  ;;  %vm734_vm11 = vcmp.le.f32.partialorder %v1811_v57, 0.04045 }
  0x3a   : > { %1580 = vpow2.f32 %v495_v15  ;;  %v162_v17 = vlaneseq }
  0x3b   : > { %1582 = vpow2.f32 %v501_v26 }
  0x3c   : > { %v1565_v27 = vpop.eup %1564  ;;  %1584 = vpow2.f32 %v499_v28 }
  0x3d   : > { %v1567_v31 = vpop.eup %1566  ;;  %v1820_v32 = vsel %vm272_vm0, %v235_v18, %v1565_v27  ;;  %1586 = vpow2.f32 %v726_v21 }
  0x3e   : > { %v1569_v33 = vpop.eup %1568  ;;  %286 = vrot.lane.b32.xlu1 %v1820_v32, %s1682_s26  ;;  %v1824_v0 = vsel %vm270_vm1, %v233_v20, %v1567_v31 }
  0x3f   : > { %v1571_v35 = vpop.eup %1570  ;;  %282 = vrot.lane.b32.xlu0 %v1824_v0, %s1682_s26  ;;  %v1829_v2 = vsel %vm273_vm2, %v236_v25, %v1569_v33  ;;  %v302_v57 = vmul.f32 0.23993598, %v1824_v0 }
  0x40   : > { %v1573_v37 = vpop.eup %1572  ;;  %v713_v44 = vmul.f32 0.6931472, %v1571_v35  ;;  %v305_v27 = vmul.f32 0.23993598, %v1829_v2 }
  0x41   : > { %v1575_v38 = vpop.eup %1574  ;;  %v719_v48 = vmul.f32 0.6931472, %v1573_v37 }
  0x42   : > { %v1577_v40 = vpop.eup %1576  ;;  %288 = vrot.lane.b32.xlu1 %v1829_v2, %s1682_s26  ;;  %v1837_v41 = vsel %vm271_vm3, %v234_v1, %v1575_v38  ;;  %v720_v50 = vmul.f32 2.4, %v713_v44  ;;  %v304_v1 = vmul.f32 0.23993598, %v1820_v32 }
  0x43   : > { %v1579_v43 = vpop.eup %1578  ;;  %284 = vrot.lane.b32.xlu0 %v1837_v41, %s1682_s26  ;;  %v1842_v8 = vsel %vm504_vm4, %v468_v36, %v1577_v40  ;;  %v723_v55 = vmul.f32 2.4, %v719_v48  ;;  %v303_v15 = vmul.f32 0.23993598, %v1837_v41 }
  0x44   : > { %v1581_v9 = vpop.eup %1580  ;;  %v717_v51 = vmul.f32 0.6931472, %v1579_v43  ;;  %v724_v22 = vmul.f32 1.442695, %v720_v50  ;;  %v1966_v50 = vshrl.u32 %v162_v17, 7 }
  0x45   : > { %v1845_v46 = vsel %vm503_vm5, %v467_v39, %v1581_v9  ;;  %v1583_v49 = vpop.eup %1582  ;;  %v730_v58 = vmul.f32 1.442695, %v723_v55 }
  0x46   : > { %517 = vrot.lane.b32.xlu1 %v1842_v8, %s1682_s26  ;;  %v1585_v52 = vpop.eup %1584  ;;  %v1854_v53 = vsel %vm506_vm6, %v470_v45, %v1583_v49  ;;  %v722_v56 = vmul.f32 2.4, %v717_v51  ;;  %1588 = vpow2.f32 %v724_v22  ;;  %v164_v55 = vadd.s32 8, %v1966_v50 }
  0x47   : > { %515 = vrot.lane.b32.xlu0 %v1845_v46, %s1682_s26  ;;  %v1856_v54 = vsel %vm505_vm7, %v469_v47, %v1585_v52  ;;  %1590 = vpow2.f32 %v730_v58  ;;  %v1587_v61 = vpop.eup %1586  ;;  %v1970_v52 = vand.u32 127, %v162_v17  ;;  %v165_v22 = vadd.s32 16, %v1966_v50 }
  0x48   : > { %v728_v59 = vmul.f32 1.442695, %v722_v56  ;;  %v1882_v3 = vsel %vm733_vm8, %v697_v60, %v1587_v61  ;;  %v185_v58 = vadd.s32 1, %v1966_v50  ;;  %v186_v61 = vadd.s32 1, %v164_v55 }
  0x4a   : > { %521 = vrot.lane.b32.xlu1 %v1854_v53, %s1682_s26  ;;  %1592 = vpow2.f32 %v728_v59  ;;  %v191_v59 = vadd.s32 1, %v1970_v52 }
  0x4b   : > { %519 = vrot.lane.b32.xlu0 %v1856_v54, %s1682_s26 }
  0x4e   : > { %312 = vrot.lane.b32.xlu1 %v1837_v41, %s1683_s27 }
  0x4f   : > { %310 = vrot.lane.b32.xlu0 %v1824_v0, %s1683_s27 }
  0x50   : > { %v1589_v63 = vpop.eup %1588 }
  0x51   : > { %v1591_v5 = vpop.eup %1590  ;;  %v1885_v6 = vsel %vm732_vm9, %v696_v62, %v1589_v63  ;;  %v187_v62 = vadd.s32 1, %v165_v22 }
  0x52   : > { %316 = vrot.lane.b32.xlu1 %v1829_v2, %s1683_s27  ;;  %v1894_v30 = vsel %vm735_vm10, %v699_v4, %v1591_v5  ;;  %v188_v4 = vand.u32 1, %v185_v58  ;;  %v1984_v5 = vand.u32 1, %v191_v59  ;;  %v2088_v59 = vadd.s32 4, %v164_v55 }
  0x53   : > { %314 = vrot.lane.b32.xlu0 %v1820_v32, %s1683_s27 }
  0x54   : > { %v1593_v7 = vpop.eup %1592  ;;  %vm193_vm12 = vcmp.eq.s32.totalorder %v188_v4, 0  ;;  %vm196_vm13 = vcmp.eq.s32.totalorder %v1984_v5, 0  ;;  %vm215_vm1 = vcmp.eq.s32.totalorder %v188_v4, 1  ;;  %vm218_vm2 = vcmp.eq.s32.totalorder %v1984_v5, 1 }
  0x55   : > { %v1896_v10 = vsel %vm734_vm11, %v698_v29, %v1593_v7  ;;  %v189_v7 = vand.u32 1, %v186_v61  ;;  %vm1998_vm0 = vmand %vm193_vm12, %vm196_vm13  ;;  %vm206_vm5 = vcmp.ne.s32.totalorder %v188_v4, %v1984_v5  ;;  %vm384_vm11 = vcmask 1046528  }
  0x56   : > { %545 = vrot.lane.b32.xlu1 %v1842_v8, %s1683_s27  ;;  %vm2031_vm7 = vmand %vm215_vm1, %vm218_vm2  ;;  %vm406_vm12 = vcmask 1045504   ;;  %vm181_vm1 = vcmp.le.s32.totalorder %v1970_v52, 24 }
  0x57   : > { %543 = vrot.lane.b32.xlu0 %v1845_v46, %s1683_s27  ;;  %vm194_vm14 = vcmp.eq.s32.totalorder %v189_v7, 0  ;;  %vm216_vm4 = vcmp.eq.s32.totalorder %v189_v7, 1  ;;  %vm207_vm8 = vcmp.ne.s32.totalorder %v189_v7, %v1984_v5 }
  0x58   : > { %vm2009_vm3 = vmand %vm194_vm14, %vm196_vm13  ;;  %vm2756_vm14 = vcmask 1043456  }
  0x59   : > { %vm220_vm9 = vmand %vm216_vm4, %vm218_vm2 }
  0x5a   : > { %549 = vrot.lane.b32.xlu1 %v1854_v53, %s1683_s27 }
  0x5b   : > { %547 = vrot.lane.b32.xlu0 %v1856_v54, %s1683_s27 }
  0x5e   : > { %746 = vrot.lane.b32.xlu1 %v1882_v3, %s1682_s26 }
  0x5f   : > { %744 = vrot.lane.b32.xlu0 %v1885_v6, %s1682_s26 }
  0x62   : > { %750 = vrot.lane.b32.xlu1 %v1894_v30, %s1682_s26 }
  0x63   : > { %748 = vrot.lane.b32.xlu0 %v1896_v10, %s1682_s26  ;;  %s1618_s26 = scalar_lea.vmem %s2706_s22, 768 }
  0x64   : > { %p1619_p11 = scmp.ne.s32.totalorder %s2706_s22, %s1618_s26 }
  0x66   : > { %332 = vrot.lane.b32.xlu1 %v1837_v41, %s1684_s28  ;;  %p1620_p12 = pnand %p1619_p11, %p1746_p5 }
  0x67   : > { %330 = vrot.lane.b32.xlu0 %v1824_v0, %s1684_s28 }
  0x68   : > { %p1621_p13 = pneg %p1620_p12 }
  0x6a   : > { %336 = vrot.lane.b32.xlu1 %v1829_v2, %s1684_s28 }
  0x6b   : > { %334 = vrot.lane.b32.xlu0 %v1820_v32, %s1684_s28 }
  0x6e   : > { %565 = vrot.lane.b32.xlu1 %v1842_v8, %s1684_s28 }
  0x6f   : > { %563 = vrot.lane.b32.xlu0 %v1845_v46, %s1684_s28 }
  0x72   : > { %569 = vrot.lane.b32.xlu1 %v1854_v53, %s1684_s28 }
  0x73   : > { %567 = vrot.lane.b32.xlu0 %v1856_v54, %s1684_s28 }
  0x76   : > { %774 = vrot.lane.b32.xlu1 %v1882_v3, %s1683_s27 }
  0x77   : > { %772 = vrot.lane.b32.xlu0 %v1885_v6, %s1683_s27 }
  0x7a   : > { %778 = vrot.lane.b32.xlu1 %v1894_v30, %s1683_s27 }
  0x7b   : > { %776 = vrot.lane.b32.xlu0 %v1896_v10, %s1683_s27  ;;  %s1690_s27 = smov [#allocation2]  }
  0x7e   : > { %352 = vrot.lane.b32.xlu1 %v1837_v41, %s1685_s29 }
  0x7f   : > { %350 = vrot.lane.b32.xlu0 %v1824_v0, %s1685_s29 }
  0x82   : > { %356 = vrot.lane.b32.xlu1 %v1829_v2, %s1685_s29 }
  0x83   : > { %354 = vrot.lane.b32.xlu0 %v1820_v32, %s1685_s29 }
  0x86   : > { %585 = vrot.lane.b32.xlu1 %v1842_v8, %s1685_s29 }
  0x87   : > { %583 = vrot.lane.b32.xlu0 %v1845_v46, %s1685_s29 }
  0x8a   : > { %589 = vrot.lane.b32.xlu1 %v1854_v53, %s1685_s29 }
  0x8b   : > { %587 = vrot.lane.b32.xlu0 %v1856_v54, %s1685_s29 }
  0x8e   : > { %794 = vrot.lane.b32.xlu1 %v1882_v3, %s1684_s28 }
  0x8f   : > { %792 = vrot.lane.b32.xlu0 %v1885_v6, %s1684_s28 }
  0x92   : > { %798 = vrot.lane.b32.xlu1 %v1894_v30, %s1684_s28 }
  0x93   : > { %796 = vrot.lane.b32.xlu0 %v1896_v10, %s1684_s28  ;;  %s1622_s28 = sshll.u32 %s1690_s27, 4  ;;  %s1623_s28 = int_to_ptr.vmem [resolvable:$false] %s1622_s28 }
  0x94   : > { %p1625_p0 = scmp.lt.s32.totalorder %s2706_s22, %s1623_s28 }
  0x96   : > { %814 = vrot.lane.b32.xlu1 %v1882_v3, %s1685_s29 }
  0x97   : > { %812 = vrot.lane.b32.xlu0 %v1885_v6, %s1685_s29 }
  0x9a   : > { %818 = vrot.lane.b32.xlu1 %v1894_v30, %s1685_s29 }
  0x9b   : > { %816 = vrot.lane.b32.xlu0 %v1896_v10, %s1685_s29  ;;  %s1624_s29 = scalar_lea.vmem %s1623_s28, 1536 }
  0x9c   : > { %p1626_p1 = scmp.lt.s32.totalorder %s1624_s29, %s1618_s26 }
  0x9e   : > { %p1627_p2 = por %p1626_p1, %p1625_p0 }
  0xa0   : > { %p1628_p3 = pnand %p1627_p2, %p1621_p13 }
  0xb0   : > { %v287_v34 = vpop.permute.xlu1 %286 }
  0xb1   : > { %v283_v11 = vpop.permute.xlu0 %282  ;;  %v296_v0 = vmul.f32 0.037657052, %v287_v34  ;;  %v1988_v34 = vand.u32 1, %v187_v62 }
  0xb2   : > { %v294_v12 = vmul.f32 0.037657052, %v283_v11 }
  0xb3   : > { %v308_v42 = vadd.f32 %v304_v1, %v296_v0  ;;  %vm195_vm15 = vcmp.eq.s32.totalorder %v1988_v34, 0  ;;  %vm208_vm10 = vcmp.ne.s32.totalorder %v1988_v34, %v1984_v5 }
  0xb4   : > { %v306_v13 = vadd.f32 %v302_v57, %v294_v12  ;;  %v289_v14 = vpop.permute.xlu1 %288  ;;  %vm2021_vm6 = vmand %vm195_vm15, %vm196_vm13  ;;  %vm420_vm13 = vcmask 1044480   ;;  %vm168_vm15 = vcmp.ge.s32.totalorder %v1966_v50, 1 }
  0xb5   : > { %v285_v16 = vpop.permute.xlu0 %284  ;;  %v297_v28 = vmul.f32 0.037657052, %v289_v14  ;;  %v536_v14 = vmul.f32 0.24273446, %v1842_v8 }
  0xb6   : > { %v295_v18 = vmul.f32 0.037657052, %v285_v16 }
  0xb7   : > { %v309_v39 = vadd.f32 %v305_v27, %v297_v28  ;;  %v765_v28 = vmul.f32 0.24420135, %v1882_v3 }
  0xb8   : > { %v307_v19 = vadd.f32 %v303_v15, %v295_v18  ;;  %v1936_v20 = vpop.permute.xlu1 %517  ;;  %v535_v18 = vmul.f32 0.24273446, %v1845_v46  ;;  %v767_v46 = vmul.f32 0.24420135, %v1894_v30 }
  0xb9   : > { %v1938_v23 = vpop.permute.xlu0 %515  ;;  %v528_v30 = vmul.f32 0.046058774, %v1936_v20 }
  0xbb   : > { %v540_v61 = vadd.f32 %v536_v14, %v528_v30 }
  0xbc   : > { %v1940_v24 = vpop.permute.xlu1 %521 }
  0xbd   : > { %v1942_v25 = vpop.permute.xlu0 %519 }
  0xc0   : > { %v313_v26 = vpop.permute.xlu1 %312 }
  0xc1   : > { %v323_v31 = vmul.f32 0.44481394, %v313_v26  ;;  %v311_v33 = vpop.permute.xlu0 %310  ;;  %v537_v26 = vmul.f32 0.24273446, %v1856_v54  ;;  %v766_v54 = vmul.f32 0.24420135, %v1896_v10 }
  0xc2   : > { %v322_v35 = vmul.f32 0.44481394, %v311_v33  ;;  %v1686_v33 = vmov 0.0  }
  0xc3   : > { %v1946_v36 = vadd.f32 %v323_v31, %v307_v19  ;;  %v538_v19 = vmul.f32 0.24273446, %v1854_v53  ;;  %v764_v31 = vmul.f32 0.24420135, %v1885_v6  ;;  %v2040_v3 = vsel %vm1998_vm0, 1.0, %v1686_v33 }
  0xc4   : > { %v1948_v37 = vadd.f32 %v322_v35, %v306_v13  ;;  %v317_v38 = vpop.permute.xlu1 %316  ;;  %v939_v13 = vadd.s32 4, %v1970_v52  ;;  %v2051_v10 = vsel %vm206_vm5, 1.0, %v1686_v33  ;;  %v2056_v1 = vsel %vm2009_vm3, 1.0, %v1686_v33 }
  0xc5   : > { %v325_v40 = vmul.f32 0.44481394, %v317_v38  ;;  %v315_v41 = vpop.permute.xlu0 %314  ;;  %v2061_v35 = vsel %vm2021_vm6, 1.0, %v1686_v33  ;;  %v527_v38 = vmul.f32 0.046058774, %v1938_v23  ;;  %v2068_v20 = vsel %vm2031_vm7, 1.0, %v1686_v33 }
  0xc6   : > { %v324_v43 = vmul.f32 0.44481394, %v315_v41  ;;  %v2042_v6 = vadd.s32 1, %v939_v13  ;;  %v2073_v41 = vsel %vm207_vm8, 1.0, %v1686_v33  ;;  %v2078_v17 = vsel %vm220_vm9, 1.0, %v1686_v33 }
  0xc7   : > { %v1950_v44 = vadd.f32 %v325_v40, %v309_v39  ;;  %v530_v39 = vmul.f32 0.046058774, %v1940_v24  ;;  %v2081_v23 = vsel %vm208_vm10, 1.0, %v1686_v33  ;;  %v539_v7 = vadd.f32 %v535_v18, %v527_v38 }
  0xc8   : > { %v1952_v2 = vadd.f32 %v324_v43, %v308_v42  ;;  %v1954_v9 = vpop.permute.xlu1 %545  ;;  %v529_v42 = vmul.f32 0.046058774, %v1942_v25  ;;  %v2086_v58 = vand.u32 1, %v2042_v6  ;;  %vm177_vm0 = vcmp.ge.s32.totalorder %v1970_v52, 1 }
  0xc9   : > { %v1956_v45 = vpop.permute.xlu0 %543  ;;  %v556_v43 = vmul.f32 0.42241353, %v1954_v9  ;;  %v542_v12 = vadd.f32 %v538_v19, %v530_v39  ;;  %vm178_vm3 = vmand %vm168_vm15, %vm177_vm0  ;;  %vm217_vm5 = vcmp.eq.s32.totalorder %v1988_v34, 1 }
  0xca   : > { %v555_v24 = vmul.f32 0.42241353, %v1956_v45  ;;  %v541_v16 = vadd.f32 %v537_v26, %v529_v42  ;;  %vm2208_vm4 = vmand %vm178_vm3, %vm181_vm1  ;;  %vm2759_vm8 = vcmp.eq.s32.totalorder %v2086_v58, 1 }
  0xcb   : > { %v560_v55 = vadd.f32 %v556_v43, %v540_v61  ;;  %vm2242_vm6 = vmand %vm177_vm0, %vm181_vm1 }
  0xcc   : > { %v1958_v32 = vpop.permute.xlu1 %549  ;;  %v559_v8 = vadd.f32 %v555_v24, %v539_v7  ;;  %vm221_vm7 = vmand %vm217_vm5, %vm218_vm2  ;;  %vm2758_vm2 = vcmp.eq.s32.totalorder %v2086_v58, 0 }
  0xcd   : > { %v1960_v47 = vpop.permute.xlu0 %547  ;;  %v558_v22 = vmul.f32 0.42241353, %v1958_v32 }
  0xce   : > { %v557_v25 = vmul.f32 0.42241353, %v1960_v47 }
  0xd0   : > { %v1962_v48 = vpop.permute.xlu1 %746 }
  0xd1   : > { %v1964_v49 = vpop.permute.xlu0 %744  ;;  %v757_v9 = vmul.f32 0.054488685, %v1962_v48 }
  0xd2   : > { %v756_v62 = vmul.f32 0.054488685, %v1964_v49 }
  0xd3   : > { %v769_v19 = vadd.f32 %v765_v28, %v757_v9 }
  0xd4   : > { %v1968_v51 = vpop.permute.xlu1 %750  ;;  %v768_v53 = vadd.f32 %v764_v31, %v756_v62 }
  0xd5   : > { %v1972_v21 = vpop.permute.xlu0 %748  ;;  %v759_v45 = vmul.f32 0.054488685, %v1968_v51  ;;  %v562_v51 = vadd.f32 %v558_v22, %v542_v12 }
  0xd6   : > { %v758_v14 = vmul.f32 0.054488685, %v1972_v21 }
  0xd7   : > { %v2104_v30 = vadd.f32 %v767_v46, %v759_v45 }
  0xd8   : > { %v1976_v56 = vpop.permute.xlu1 %332 }
  0xd9   : > { %v1980_v60 = vpop.permute.xlu0 %330  ;;  %v343_v32 = vmul.f32 0.23993598, %v1976_v56  ;;  %v561_v56 = vadd.f32 %v557_v25, %v541_v16 }
  0xda   : > { %v342_v47 = vmul.f32 0.23993598, %v1980_v60 }
  0xdb   : > { %v347_v21 = vadd.f32 %v343_v32, %v1946_v36 }
  0xdc   : > { %v1982_v63 = vpop.permute.xlu1 %336 }
  0xdd   : > { %v1986_v29 = vpop.permute.xlu0 %334  ;;  %v345_v48 = vmul.f32 0.23993598, %v1982_v63 }
  0xde   : > { %v344_v49 = vmul.f32 0.23993598, %v1986_v29  ;;  %v2108_v29 = vadd.f32 %v766_v54, %v758_v14 }
  0xdf   : > { %v349_v28 = vadd.f32 %v345_v48, %v1950_v44 }
  0xe0   : > { %v1990_v57 = vpop.permute.xlu1 %565  ;;  %v348_v31 = vadd.f32 %v344_v49, %v1952_v2 }
  0xe1   : > { %v1993_v11 = vpop.permute.xlu0 %563  ;;  %v576_v18 = vmul.f32 0.24273446, %v1990_v57  ;;  %v346_v57 = vadd.f32 %v342_v47, %v1948_v37 }
  0xe2   : > { %v575_v60 = vmul.f32 0.24273446, %v1993_v11 }
  0xe3   : > { %v580_v46 = vadd.f32 %v576_v18, %v560_v55 }
  0xe4   : > { %v2005_v15 = vpop.permute.xlu1 %569  ;;  %v579_v25 = vadd.f32 %v575_v60, %v559_v8 }
  0xe5   : > { %v2016_v27 = vpop.permute.xlu0 %567  ;;  %v578_v39 = vmul.f32 0.24273446, %v2005_v15 }
  0xe6   : > { %v577_v36 = vmul.f32 0.24273446, %v2016_v27 }
  0xe7   : > { %v2119_v62 = vadd.f32 %v578_v39, %v562_v51 }
  0xe8   : > { %v775_v0 = vpop.permute.xlu1 %774  ;;  %v2124_v47 = vadd.f32 %v577_v36, %v561_v56 }
  0xe9   : > { %v773_v40 = vpop.permute.xlu0 %772  ;;  %v785_v24 = vmul.f32 0.40261996, %v775_v0 }
  0xea   : > { %v784_v11 = vmul.f32 0.40261996, %v773_v40 }
  0xec   : > { %v2093_v4 = vpop.permute.xlu1 %778 }
  0xed   : > { %v2097_v13 = vpop.permute.xlu0 %776  ;;  %v2134_v56 = vmul.f32 0.40261996, %v2093_v4 }
  0xf0   : > { %v353_v26 = vpop.permute.xlu1 %352 }
  0xf1   : > { %v363_v38 = vmul.f32 0.037657052, %v353_v26  ;;  %v351_v63 = vpop.permute.xlu0 %350 }
  0xf2   : > { %v362_v42 = vmul.f32 0.037657052, %v351_v63 }
  0xf3   : > { %v367_v43 = vadd.f32 %v363_v38, %v347_v21  ;;  %v2129_v38 = vadd.f32 %v785_v24, %v769_v19 }
  0xf4   : > { %v366_v22 = vadd.f32 %v362_v42, %v346_v57  ;;  %v357_v61 = vpop.permute.xlu1 %356  ;;  %v2131_v42 = vadd.f32 %v784_v11, %v768_v53 }
  0xf5   : > { %v2115_v54 = vmul.f32 0.037657052, %v367_v43  ;;  %v2117_v9 = vmul.f32 0.23993598, %v367_v43  ;;  %v399_v37 = vmul.f32 0.44481394, %v367_v43  ;;  %v355_v15 = vpop.permute.xlu0 %354 }
  0xf6   : > { %v370_v44 = vmul.f32 0.037657052, %v366_v22  ;;  %v376_v7 = vmul.f32 0.23993598, %v366_v22  ;;  %v398_v2 = vmul.f32 0.44481394, %v366_v22 }
  0xf7   : > { %v386_v12 = vrot.slane %v2117_v9, 1  ;;  %v408_v45 = vrot.slane %v399_v37, 2  ;;  %v422_v27 = vrot.slane %v2117_v9, 3  ;;  %v441_v0 = vrot.slane %v2115_v54, 4 }
  0xf8   : > { %v385_v40 = vrot.slane %v376_v7, 1  ;;  %v407_v32 = vrot.slane %v398_v2, 2  ;;  %v421_v16 = vrot.slane %v376_v7, 3  ;;  %v440_v55 = vrot.slane %v370_v44, 4  ;;  %v586_v14 = vpop.permute.xlu1 %585 }
  0xf9   : > { %v365_v8 = vmul.f32 0.037657052, %v357_v61  ;;  %v364_v48 = vmul.f32 0.037657052, %v355_v15  ;;  %v596_v49 = vmul.f32 0.046058774, %v586_v14  ;;  %v584_v18 = vpop.permute.xlu0 %583 }
  0xfa   : > { %v387_v51 = vsel %vm384_vm11, %v385_v40, %v386_v12  ;;  %v409_v26 = vsel %vm406_vm12, %v407_v32, %v408_v45  ;;  %v423_v21 = vsel %vm420_vm13, %v421_v16, %v422_v27  ;;  %v595_v60 = vmul.f32 0.046058774, %v584_v18 }
  0xfb   : > { %v395_v63 = vadd.f32 %v387_v51, %v370_v44  ;;  %v369_v57 = vadd.f32 %v365_v8, %v349_v28  ;;  %v368_v39 = vadd.f32 %v364_v48, %v348_v31  ;;  %v600_v43 = vadd.f32 %v596_v49, %v580_v46 }
  0xfc   : > { %v590_v36 = vpop.permute.xlu1 %589  ;;  %v442_v22 = vsel %vm2756_vm14, %v440_v55, %v441_v0  ;;  %v599_v44 = vadd.f32 %v595_v60, %v579_v25 }
  0xfd   : > { %v417_v61 = vadd.f32 %v409_v26, %v395_v63  ;;  %v379_v9 = vmul.f32 0.23993598, %v369_v57  ;;  %v401_v37 = vmul.f32 0.44481394, %v369_v57  ;;  %v434_v15 = vmul.f32 0.037657052, %v369_v57  ;;  %v588_v7 = vpop.permute.xlu0 %587 }
  0xfe   : > { %v372_v2 = vmul.f32 0.037657052, %v368_v39  ;;  %v378_v19 = vmul.f32 0.23993598, %v368_v39  ;;  %v400_v24 = vmul.f32 0.44481394, %v368_v39 }
  0xff   : > { %v431_v28 = vadd.f32 %v423_v21, %v417_v61  ;;  %v390_v31 = vrot.slane %v379_v9, 1  ;;  %v412_v53 = vrot.slane %v401_v37, 2  ;;  %v426_v11 = vrot.slane %v379_v9, 3 }
 0x100   : > { %v445_v40 = vrot.slane %v434_v15, 4  ;;  %v388_v4 = vrot.slane %v378_v19, 1  ;;  %v410_v32 = vrot.slane %v400_v24, 2  ;;  %v424_v46 = vrot.slane %v378_v19, 3  ;;  %v795_v16 = vpop.permute.xlu1 %794 }
 0x101   : > { %v443_v14 = vrot.slane %v372_v2, 4  ;;  %v2137_v55 = vmul.f32 0.046058774, %v600_v43  ;;  %v2139_v8 = vmul.f32 0.24273446, %v600_v43  ;;  %v793_v48 = vpop.permute.xlu0 %792  ;;  %v2141_v49 = vadd.f32 %v442_v22, %v431_v28 }
 0x102   : > { %v389_v18 = vsel %vm384_vm11, %v386_v12, %v388_v4  ;;  %v391_v25 = vsel %vm384_vm11, %v388_v4, %v390_v31  ;;  %v411_v51 = vsel %vm406_vm12, %v408_v45, %v410_v32  ;;  %v413_v26 = vsel %vm406_vm12, %v410_v32, %v412_v53 }
 0x103   : > { %v396_v21 = vadd.f32 %v389_v18, %v2115_v54  ;;  %v397_v60 = vadd.f32 %v391_v25, %v372_v2  ;;  %v425_v63 = vsel %vm420_vm13, %v422_v27, %v424_v46  ;;  %v427_v57 = vsel %vm420_vm13, %v424_v46, %v426_v11 }
 0x104   : > { %v2151_v39 = vmul.f32 0.40261996, %v2097_v13  ;;  %v2154_v22 = vsel %vm2756_vm14, %v441_v0, %v443_v14  ;;  %v2157_v12 = vsel %vm2756_vm14, %v443_v14, %v445_v40  ;;  %v2159_v61 = vmul.f32 0.42241353, %v600_v43  ;;  %v799_v27 = vpop.permute.xlu1 %798 }
 0x105   : > { %v418_v45 = vadd.f32 %v411_v51, %v396_v21  ;;  %v419_v9 = vadd.f32 %v413_v26, %v397_v60  ;;  %v618_v54 = vrot.slane %v2139_v8, 1  ;;  %v652_v37 = vrot.slane %v2139_v8, 3  ;;  %v797_v15 = vpop.permute.xlu0 %796 }
 0x106   : > { %v639_v2 = vrot.slane %v2159_v61, 2  ;;  %v670_v13 = vrot.slane %v2137_v55, 4  ;;  %v2165_v19 = vmul.f32 0.046058774, %v599_v44  ;;  %v609_v0 = vmul.f32 0.24273446, %v599_v44 }
 0x107   : > { %v2167_v24 = vadd.f32 %v425_v63, %v418_v45  ;;  %v2169_v28 = vadd.f32 %v427_v57, %v419_v9  ;;  %v630_v43 = vmul.f32 0.42241353, %v599_v44  ;;  %v598_v31 = vmul.f32 0.046058774, %v590_v36 }
 0x108   : > { %v617_v53 = vrot.slane %v609_v0, 1  ;;  %v651_v11 = vrot.slane %v609_v0, 3  ;;  %v669_v40 = vrot.slane %v2165_v19, 4  ;;  %v597_v4 = vmul.f32 0.046058774, %v588_v7  ;;  %v815_v60 = vpop.permute.xlu1 %814 }
 0x109   : > { %v638_v32 = vrot.slane %v630_v43, 2  ;;  %v602_v46 = vadd.f32 %v598_v31, %v2119_v62  ;;  %v805_v14 = vmul.f32 0.24420135, %v795_v16  ;;  %v804_v8 = vmul.f32 0.24420135, %v793_v48  ;;  %v813_v63 = vpop.permute.xlu0 %812 }
 0x10a   : > { %v619_v18 = vsel %vm384_vm11, %v617_v53, %v618_v54  ;;  %v653_v25 = vsel %vm420_vm13, %v651_v11, %v652_v37  ;;  %v601_v36 = vadd.f32 %v597_v4, %v2124_v47  ;;  %v807_v44 = vmul.f32 0.24420135, %v799_v27 }
 0x10b   : > { %v627_v51 = vadd.f32 %v619_v18, %v2165_v19  ;;  %v640_v7 = vsel %vm406_vm12, %v638_v32, %v639_v2  ;;  %v612_v26 = vmul.f32 0.24273446, %v602_v46  ;;  %v633_v21 = vmul.f32 0.42241353, %v602_v46 }
 0x10c   : > { %v791_v62 = vadd.f32 %v2134_v56, %v2104_v30  ;;  %v664_v16 = vmul.f32 0.046058774, %v602_v46  ;;  %v605_v48 = vmul.f32 0.046058774, %v601_v36  ;;  %v611_v57 = vmul.f32 0.24273446, %v601_v36 }
 0x10d   : > { %v648_v61 = vadd.f32 %v640_v7, %v627_v51  ;;  %v622_v45 = vrot.slane %v612_v26, 1  ;;  %v643_v47 = vrot.slane %v633_v21, 2  ;;  %v656_v9 = vrot.slane %v612_v26, 3 }
 0x10e   : > { %v674_v27 = vrot.slane %v664_v16, 4  ;;  %v620_v0 = vrot.slane %v611_v57, 1  ;;  %v632_v43 = vmul.f32 0.42241353, %v601_v36  ;;  %v654_v31 = vrot.slane %v611_v57, 3  ;;  %v819_v36 = vpop.permute.xlu1 %818 }
 0x10f   : > { %v661_v53 = vadd.f32 %v653_v25, %v648_v61  ;;  %v672_v11 = vrot.slane %v605_v48, 4  ;;  %v809_v4 = vadd.f32 %v805_v14, %v2129_v38  ;;  %v808_v32 = vadd.f32 %v804_v8, %v2131_v42  ;;  %v817_v38 = vpop.permute.xlu0 %816 }
 0x110   : > { %v621_v18 = vsel %vm384_vm11, %v618_v54, %v620_v0  ;;  %v623_v30 = vsel %vm384_vm11, %v620_v0, %v622_v45  ;;  %v641_v56 = vrot.slane %v632_v43, 2  ;;  %v655_v46 = vsel %vm420_vm13, %v652_v37, %v654_v31 }
 0x111   : > { %v628_v51 = vadd.f32 %v621_v18, %v2137_v55  ;;  %v629_v7 = vadd.f32 %v623_v30, %v605_v48  ;;  %v657_v26 = vsel %vm420_vm13, %v654_v31, %v656_v9  ;;  %v673_v25 = vsel %vm2756_vm14, %v670_v13, %v672_v11 }
 0x112   : > { %v642_v42 = vsel %vm406_vm12, %v639_v2, %v641_v56  ;;  %v644_v54 = vsel %vm406_vm12, %v641_v56, %v643_v47  ;;  %v2196_v14 = vsel %vm2756_vm14, %v672_v11, %v674_v27  ;;  %v806_v8 = vmul.f32 0.24420135, %v797_v15 }
 0x113   : > { %v649_v37 = vadd.f32 %v642_v42, %v628_v51  ;;  %v650_v21 = vadd.f32 %v644_v54, %v629_v7  ;;  %v825_v16 = vmul.f32 0.054488685, %v815_v60  ;;  %v824_v48 = vmul.f32 0.054488685, %v813_v63 }
 0x114   : > { %v790_v57 = vadd.f32 %v2151_v39, %v2108_v29  ;;  %v811_v61 = vadd.f32 %v807_v44, %v791_v62  ;;  %v827_v2 = vmul.f32 0.054488685, %v819_v36  ;;  %v826_v45 = vmul.f32 0.054488685, %v817_v38 }
 0x115   : > { %v662_v47 = vadd.f32 %v655_v46, %v649_v37  ;;  %v2204_v9 = vadd.f32 %v657_v26, %v650_v21  ;;  %v829_v27 = vadd.f32 %v825_v16, %v809_v4  ;;  %v828_v15 = vadd.f32 %v824_v48, %v808_v32 }
 0x116   : > { %v810_v0 = vadd.f32 %v806_v8, %v790_v57  ;;  %v831_v43 = vadd.f32 %v827_v2, %v811_v61  ;;  %v671_v29 = vsel %vm2756_vm14, %v669_v40, %v670_v13  ;;  %v451_v39 = vadd.f32 %v2154_v22, %v2167_v24 }
 0x117   : > { %v2219_v44 = vmul.f32 0.054488685, %v829_v27  ;;  %v2221_v63 = vmul.f32 0.24420135, %v829_v27  ;;  %v860_v62 = vmul.f32 0.40261996, %v829_v27  ;;  %v679_v31 = vadd.f32 %v671_v29, %v661_v53 }
 0x118   : > { %v832_v11 = vmul.f32 0.054488685, %v828_v15  ;;  %v838_v4 = vmul.f32 0.24420135, %v828_v15  ;;  %v859_v32 = vmul.f32 0.40261996, %v828_v15  ;;  %v680_v18 = vadd.f32 %v673_v25, %v662_v47 }
 0x119   : > { %v847_v30 = vrot.slane %v2221_v63, 1  ;;  %v868_v55 = vrot.slane %v860_v62, 2  ;;  %v830_v56 = vadd.f32 %v826_v45, %v810_v0  ;;  %v453_v13 = vsel %vm2208_vm4, %v2141_v49, 0.0 }
 0x11a   : > { %v881_v22 = vrot.slane %v2221_v63, 3  ;;  %v846_v19 = vrot.slane %v838_v4, 1  ;;  %v867_v24 = vrot.slane %v859_v32, 2  ;;  %v880_v40 = vrot.slane %v838_v4, 3 }
 0x11b   : > { %v841_v46 = vmul.f32 0.24420135, %v831_v43  ;;  %v862_v51 = vmul.f32 0.40261996, %v831_v43  ;;  %v2229_v53 = vadd.s32 1, %v2088_v59  ;;  %v452_v7 = vadd.f32 %v2157_v12, %v2169_v28 }
 0x11c   : > { %v899_v26 = vrot.slane %v2219_v44, 4  ;;  %v848_v25 = vsel %vm384_vm11, %v846_v19, %v847_v30  ;;  %v898_v49 = vrot.slane %v832_v11, 4  ;;  %v456_v36 = vmul.f32 %v2040_v3, %v453_v13 }
 0x11d   : > { %v856_v38 = vadd.f32 %v848_v25, %v832_v11  ;;  %v869_v42 = vsel %vm406_vm12, %v867_v24, %v868_v55  ;;  %v893_v54 = vmul.f32 0.054488685, %v831_v43  ;;  %v834_v8 = vmul.f32 0.054488685, %v830_v56 }
 0x11e   : > { %v882_v12 = vsel %vm420_vm13, %v880_v40, %v881_v22  ;;  %v851_v28 = vrot.slane %v841_v46, 1  ;;  %v840_v37 = vmul.f32 0.24420135, %v830_v56  ;;  %v861_v21 = vmul.f32 0.40261996, %v830_v56 }
 0x11f   : > { %v877_v3 = vadd.f32 %v869_v42, %v856_v38  ;;  %v872_v16 = vrot.slane %v862_v51, 2  ;;  %v885_v48 = vrot.slane %v841_v46, 3  ;;  %v682_v57 = vsel %vm2208_vm4, %v679_v31, 0.0 }
 0x120   : > { %v849_v61 = vrot.slane %v840_v37, 1  ;;  %v870_v2 = vrot.slane %v861_v21, 2  ;;  %v685_v52 = vmul.f32 %v2051_v10, %v682_v57  ;;  %v454_v45 = vsel %vm2242_vm6, %v451_v39, 0.0  ;;  %v922_v21 = vld [vmem:[%s2266_s5 + $0x10] sm:$0xff] }
 0x121   : > { %v903_v47 = vrot.slane %v893_v54, 4  ;;  %v901_v27 = vrot.slane %v834_v8, 4  ;;  %v890_v15 = vadd.f32 %v882_v12, %v877_v3  ;;  %v683_v0 = vsel %vm2242_vm6, %v680_v18, 0.0 }
 0x122   : > { %v850_v43 = vsel %vm384_vm11, %v847_v30, %v849_v61  ;;  %v852_v29 = vsel %vm384_vm11, %v849_v61, %v851_v28  ;;  %v883_v63 = vrot.slane %v840_v37, 3  ;;  %v900_v62 = vsel %vm2756_vm14, %v898_v49, %v899_v26  ;;  %v921_v37 = vld [vmem:[%s2266_s5 + $0x8] sm:$0xff] }
 0x123   : > { %v857_v31 = vadd.f32 %v850_v43, %v2219_v44  ;;  %v858_v10 = vadd.f32 %v852_v29, %v834_v8  ;;  %v871_v11 = vsel %vm406_vm12, %v868_v55, %v870_v2  ;;  %v457_v39 = vmul.f32 %v2056_v1, %v454_v45 }
 0x124   : > { %v873_v4 = vsel %vm406_vm12, %v870_v2, %v872_v16  ;;  %v688_v32 = vadd.f32 %v685_v52, %v456_v36  ;;  %v908_v56 = vadd.f32 %v900_v62, %v890_v15  ;;  %v686_v18 = vmul.f32 %v2073_v41, %v683_v0 }
 0x125   : > { %v878_v30 = vadd.f32 %v871_v11, %v857_v31  ;;  %v879_v13 = vadd.f32 %v873_v4, %v858_v10  ;;  %v455_v44 = vsel %vm2242_vm6, %v452_v7, 0.0  ;;  %v681_v1 = vadd.f32 %v2196_v14, %v2204_v9  ;;  %v920_v9 = vld [vmem:[%s2266_s5] sm:$0xff] }
 0x126   : > { %v884_v55 = vsel %vm420_vm13, %v881_v22, %v883_v63  ;;  %v886_v19 = vsel %vm420_vm13, %v883_v63, %v885_v48  ;;  %v911_v41 = vsel %vm2208_vm4, %v908_v56, 0.0  ;;  %v689_v24 = vadd.f32 %v686_v18, %v457_v39 }
 0x127   : > { %v914_v40 = vmul.f32 %v2068_v20, %v911_v41  ;;  %v891_v46 = vadd.f32 %v884_v55, %v878_v30  ;;  %v684_v51 = vsel %vm2242_vm6, %v681_v1, 0.0  ;;  %v892_v14 = vadd.f32 %v886_v19, %v879_v13 }
 0x128   : > { %v902_v22 = vsel %vm2756_vm14, %v899_v26, %v901_v27  ;;  %v458_v7 = vmul.f32 %v2061_v35, %v455_v44  ;;  %v687_v25 = vmul.f32 %v2081_v23, %v684_v51  ;;  %v904_v5 = vsel %vm2756_vm14, %v901_v27, %v903_v47 }
 0x129   : > { %v917_v34 = vadd.f32 %v914_v40, %v688_v32  ;;  %v909_v49 = vadd.f32 %v902_v22, %v891_v46  ;;  %v1449_v20 = vsel %vm221_vm7, 1.0, %v1686_v33  ;;  %v910_v36 = vadd.f32 %v904_v5, %v892_v14 }
 0x12a   : > { %v690_v38 = vadd.f32 %v687_v25, %v458_v7  ;;  %v2294_v35 = vand.u32 1, %v2229_v53  ;;  %v942_v23 = vadd.s32 1, %v2042_v6  ;;  %v936_v52 = vadd.s32 1, %v2229_v53 }
 0x12b   : > { %v923_v42 = vadd.f32 %v920_v9, %v917_v34  ;;  %v912_v54 = vsel %vm2242_vm6, %v909_v49, 0.0  ;;  %v913_v26 = vsel %vm2242_vm6, %v910_v36, 0.0  ;;  %v2779_v47 = vmov 0 }
 0x12c   : > { %v915_v8 = vmul.f32 %v2078_v17, %v912_v54  ;;  %v916_v12 = vmul.f32 %v1449_v20, %v913_v26  ;;  %vm945_vm9 = vcmp.eq.s32.totalorder %v2294_v35, 0  ;;  %vm993_vm10 = vcmp.eq.s32.totalorder %v2294_v35, 1 }
 0x12d   : > { %v926_v28 = vsel %vm2208_vm4, %v923_v42, 0.0  ;;  %vm2310_vm11 = vmand %vm945_vm9, %vm2758_vm2  ;;  %v2314_v60 = vand.u32 1, %v942_v23  ;;  %v2331_v45 = vand.u32 1, %v936_v52  ;;  %v2781_v53 = vmov 0 }
 0x12e   : > { %1025 = vrot.lane.b32.xlu0 %v926_v28, %s1687_s6  ;;  %v918_v3 = vadd.f32 %v915_v8, %v689_v24  ;;  %v919_v6 = vadd.f32 %v916_v12, %v690_v38  ;;  %vm2320_vm12 = vmand %vm993_vm10, %vm2759_vm8  ;;  %v2783_v59 = vmov 0  ;;  %v2785_v27 = vmov 0 }
 0x12f   : > { %vm953_vm13 = vcmp.eq.s32.totalorder %v2314_v60, 0  ;;  %vm2757_vm15 = vcmp.eq.s32.totalorder %v2314_v60, 1  ;;  %vm961_vm4 = vcmp.eq.s32.totalorder %v2331_v45, 0  ;;  %vm1009_vm7 = vcmp.eq.s32.totalorder %v2331_v45, 1 }
 0x130   : > { %v924_v16 = vadd.f32 %v921_v37, %v918_v3  ;;  %v925_v48 = vadd.f32 %v922_v21, %v919_v6  ;;  %vm2337_vm0 = vmand %vm945_vm9, %vm953_vm13  ;;  %v2787_v15 = vmov 0  ;;  %v2789_v0 = vmov 0 }
 0x131   : > { %v2780_v47 = vsel %vm2337_vm0, 4294967295, %v2779_v47  ;;  %vm2347_vm3 = vmand %vm993_vm10, %vm2757_vm15  ;;  %v929_v43 = vadd.s32 4, %v1966_v50  ;;  %vm1082_vm0 = vcmask 1041408   ;;  %v2415_v32 = vsel %vm2310_vm11, 1.0, %v1686_v33 }
 0x132   : > { %v927_v61 = vsel %vm2242_vm6, %v924_v16, 0.0  ;;  %v928_v2 = vsel %vm2242_vm6, %v925_v48, 0.0  ;;  %v2782_v53 = vsel %vm2347_vm3, 4294967295, %v2781_v53  ;;  %vm2356_vm6 = vmand %vm961_vm4, %vm953_vm13  ;;  %v2420_v56 = vsel %vm2320_vm12, 1.0, %v1686_v33 }
 0x133   : > { %1027 = vrot.lane.b32.xlu1 %v927_v61, %s1687_s6  ;;  %1029 = vrot.lane.b32.xlu0 %v928_v2, %s1687_s6  ;;  %v2784_v59 = vsel %vm2356_vm6, 4294967295, %v2783_v59  ;;  %vm2363_vm9 = vmand %vm1009_vm7, %vm2757_vm15  ;;  %v931_v29 = vadd.s32 1, %v929_v43  ;;  %vm2801_vm12 = vnez %v2780_v47 }
 0x134   : > { %v2786_v27 = vsel %vm2363_vm9, 4294967295, %v2785_v27  ;;  %vm2371_vm14 = vmand %vm961_vm4, %vm2758_vm2  ;;  %vm2793_vm9 = vcmp.eq.s32.totalorder %v2314_v60, 1  ;;  %v2458_v41 = vsel %vm2801_vm12, 1.0, %v1686_v33 }
 0x135   : > { %v2788_v15 = vsel %vm2371_vm14, 4294967295, %v2787_v15  ;;  %vm2377_vm5 = vmand %vm1009_vm7, %vm2759_vm8  ;;  %v933_v63 = vand.u32 1, %v931_v29  ;;  %v935_v62 = vadd.s32 1, %v931_v29 }
 0x136   : > { %v2790_v0 = vsel %vm2377_vm5, 4294967295, %v2789_v0 }
 0x137   : > { %1034 = vrot.lane.b32.xlu1 %v926_v28, %s1688_s7  ;;  %1036 = vrot.lane.b32.xlu0 %v927_v61, %s1688_s7  ;;  %vm944_vm10 = vcmp.eq.s32.totalorder %v933_v63, 0  ;;  %vm992_vm1 = vcmp.eq.s32.totalorder %v933_v63, 1  ;;  %v937_v31 = vand.u32 1, %v935_v62  ;;  %vm974_vm14 = vcmp.ne.s32.totalorder %v933_v63, %v2314_v60 }
 0x138   : > { %vm947_vm4 = vmand %vm944_vm10, %vm2758_vm2  ;;  %v2423_v18 = vsel %vm974_vm14, 1.0, %v1686_v33  ;;  %vm2800_vm14 = vcmp.eq.s32.totalorder %v2086_v58, 1 }
 0x139   : > { %vm995_vm15 = vmand %vm992_vm1, %vm2759_vm8  ;;  %vm960_vm5 = vcmp.eq.s32.totalorder %v937_v31, 0  ;;  %vm986_vm8 = vcmp.ne.s32.totalorder %v937_v31, %v2314_v60  ;;  %vm1008_vm3 = vcmp.eq.s32.totalorder %v937_v31, 1  ;;  %v2404_v39 = vsel %vm947_vm4, 1.0, %v1686_v33 }
 0x13a   : > { %vm2388_vm7 = vmand %vm944_vm10, %vm953_vm13  ;;  %v2407_v4 = vsel %vm995_vm15, 1.0, %v1686_v33  ;;  %vm1068_vm10 = vcmask 1042432   ;;  %vm980_vm4 = vcmp.ne.s32.totalorder %v937_v31, %v2086_v58  ;;  %v2442_v1 = vsel %vm986_vm8, 1.0, %v1686_v33 }
 0x13b   : > { %1038 = vrot.lane.b32.xlu1 %v928_v2, %s1688_s7  ;;  %1043 = vrot.lane.b32.xlu0 %v926_v28, %s1689_s8  ;;  %vm2395_vm6 = vmand %vm992_vm1, %vm2793_vm9  ;;  %v2436_v13 = vsel %vm2388_vm7, 1.0, %v1686_v33  ;;  %vm2803_vm8 = vnez %v2782_v53  ;;  %v2488_v9 = vsel %vm980_vm4, 1.0, %v1686_v33  ;;  %vm2807_vm7 = vcmp.ne.s32.totalorder %v2331_v45, %v2086_v58 }
 0x13c   : > { %vm968_vm2 = vmand %vm960_vm5, %vm953_vm13  ;;  %vm2797_vm13 = vcmp.eq.s32.totalorder %v2086_v58, 0  ;;  %v2447_v55 = vsel %vm2395_vm6, 1.0, %v1686_v33  ;;  %v2469_v40 = vsel %vm2803_vm8, 1.0, %v1686_v33  ;;  %vm2806_vm6 = vnez %v2786_v27 }
 0x13d   : > { %vm2796_vm1 = vmmov %vm2793_vm9  ;;  %v2439_v44 = vsel %vm968_vm2, 1.0, %v1686_v33  ;;  %vm2802_vm2 = vcmp.ne.s32.totalorder %v2294_v35, %v2314_v60  ;;  %v2485_v14 = vsel %vm2806_vm6, 1.0, %v1686_v33  ;;  %v2502_v49 = vsel %vm2807_vm7, 1.0, %v1686_v33 }
 0x13e   : > { %vm1016_vm9 = vmand %vm1008_vm3, %vm2796_vm1  ;;  %v2464_v24 = vsel %vm2802_vm2, 1.0, %v1686_v33  ;;  %vm2808_vm1 = vnez %v2788_v15 }
 0x13f   : > { %1045 = vrot.lane.b32.xlu1 %v927_v61, %s1689_s8  ;;  %1047 = vrot.lane.b32.xlu0 %v928_v2, %s1689_s8  ;;  %vm2428_vm15 = vmand %vm960_vm5, %vm2797_vm13  ;;  %v2453_v19 = vsel %vm1016_vm9, 1.0, %v1686_v33  ;;  %vm2805_vm5 = vcmp.ne.s32.totalorder %v2331_v45, %v2314_v60  ;;  %v2507_v23 = vsel %vm2808_vm1, 1.0, %v1686_v33  ;;  %vm2809_vm9 = vcmask 1043456  }
 0x140   : > { %vm1010_vm11 = vmand %vm1008_vm3, %vm2800_vm14  ;;  %vm2804_vm3 = vnez %v2784_v59  ;;  %v2480_v51 = vsel %vm2805_vm5, 1.0, %v1686_v33  ;;  %v2493_v5 = vsel %vm2428_vm15, 1.0, %v1686_v33  ;;  %vm2811_vm15 = vnez %v2790_v0 }
 0x141   : > { %v2474_v46 = vsel %vm2804_vm3, 1.0, %v1686_v33  ;;  %v2496_v34 = vsel %vm1010_vm11, 1.0, %v1686_v33  ;;  %vm2810_vm13 = vmmov %vm2809_vm9  ;;  %v2522_v61 = vsel %vm2811_vm15, 1.0, %v1686_v33 }
 0x142   : > { %vm2812_vm4 = vmmov %vm2809_vm9 }
 0x143   : > { %vm2813_vm14 = vmmov %vm2812_vm4 }
 0x144   : > { %vm2814_vm11 = vmmov %vm2812_vm4 }
 0x145   : > { %vm2815_vm12 = vmmov %vm2812_vm4 }
 0x1a0   : > { %v1026_v11 = vpop.permute.xlu0 %1025 }
 0x1a1   : > { %v1055_v22 = vrot.slane %v1026_v11, 4  ;;  %v1083_v20 = vrot.slane %v1026_v11, 6  ;;  %v1069_v8 = vrot.slane %v1026_v11, 5 }
 0x1a5   : > { %v1028_v7 = vpop.permute.xlu1 %1027  ;;  %v1030_v25 = vpop.permute.xlu0 %1029 }
 0x1a6   : > { %v1056_v36 = vrot.slane %v1028_v7, 4  ;;  %v1084_v38 = vrot.slane %v1028_v7, 6  ;;  %v1058_v42 = vrot.slane %v1030_v25, 4  ;;  %v1070_v54 = vrot.slane %v1028_v7, 5 }
 0x1a7   : > { %v1072_v26 = vrot.slane %v1030_v25, 5  ;;  %v1086_v35 = vrot.slane %v1030_v25, 6 }
 0x1a8   : > { %v1057_v12 = vsel %vm2809_vm9, %v1055_v22, %v1056_v36  ;;  %v1085_v28 = vsel %vm1082_vm0, %v1083_v20, %v1084_v38  ;;  %v1059_v58 = vsel %vm2810_vm13, %v1056_v36, %v1058_v42  ;;  %v2527_v52 = vsel %vm1068_vm10, %v1069_v8, %v1070_v54 }
 0x1a9   : > { %v1062_v37 = vmul.f32 %v2404_v39, %v1057_v12  ;;  %v1090_v21 = vmul.f32 %v2404_v39, %v1085_v28  ;;  %v1265_v3 = vmul.f32 %v2407_v4, %v1057_v12  ;;  %v1277_v6 = vmul.f32 %v2407_v4, %v1085_v28  ;;  %v1035_v17 = vpop.permute.xlu1 %1034  ;;  %v1037_v57 = vpop.permute.xlu0 %1036 }
 0x1aa   : > { %v1063_v60 = vmul.f32 %v2415_v32, %v1059_v58  ;;  %v1087_v16 = vsel %vm1082_vm0, %v1084_v38, %v1086_v35  ;;  %v1266_v48 = vmul.f32 %v2420_v56, %v1059_v58  ;;  %v2532_v47 = vsel %vm1068_vm10, %v1070_v54, %v1072_v26 }
 0x1ab   : > { %v2524_v2 = vmul.f32 0.25, %v1062_v37  ;;  %v2529_v45 = vmul.f32 0.25, %v1090_v21  ;;  %v2534_v53 = vmul.f32 0.25, %v1265_v3  ;;  %v2536_v59 = vmul.f32 0.25, %v1277_v6 }
 0x1ac   : > { %v1091_v27 = vmul.f32 %v2415_v32, %v1087_v16  ;;  %v1278_v15 = vmul.f32 %v2420_v56, %v1087_v16  ;;  %v1099_v33 = vrot.slane %v1035_v17, 4  ;;  %v1112_v0 = vrot.slane %v1035_v17, 5 }
 0x1ad   : > { %v1123_v43 = vrot.slane %v1035_v17, 6  ;;  %v1100_v29 = vrot.slane %v1037_v57, 4  ;;  %v1039_v63 = vpop.permute.xlu1 %1038  ;;  %v2540_v62 = vmul.f32 0.25, %v1063_v60  ;;  %v2542_v31 = vmul.f32 0.25, %v1266_v48  ;;  %v1044_v48 = vpop.permute.xlu0 %1043 }
 0x1ae   : > { %v1113_v10 = vrot.slane %v1037_v57, 5  ;;  %v1124_v50 = vrot.slane %v1037_v57, 6  ;;  %v1102_v30 = vrot.slane %v1039_v63, 4  ;;  %v1115_v22 = vrot.slane %v1039_v63, 5 }
 0x1af   : > { %v1101_v11 = vsel %vm2812_vm4, %v1099_v33, %v1100_v29  ;;  %v1126_v7 = vrot.slane %v1039_v63, 6  ;;  %v2549_v42 = vmul.f32 0.25, %v1091_v27  ;;  %v2551_v54 = vmul.f32 0.25, %v1278_v15 }
 0x1b0   : > { %v1106_v25 = vmul.f32 %v2436_v13, %v1101_v11  ;;  %v1114_v20 = vsel %vm1068_vm10, %v1112_v0, %v1113_v10  ;;  %v1125_v36 = vsel %vm1082_vm0, %v1123_v43, %v1124_v50  ;;  %v1214_v38 = vmul.f32 %v2423_v18, %v1101_v11 }
 0x1b1   : > { %v1130_v26 = vmul.f32 %v2436_v13, %v1125_v36  ;;  %v1224_v35 = vmul.f32 %v2423_v18, %v1125_v36  ;;  %v2556_v12 = vmul.f32 %v2439_v44, %v1114_v20  ;;  %v1220_v28 = vmul.f32 %v2442_v1, %v1114_v20  ;;  %v2582_v33 = vpop.permute.xlu1 %1045 }
 0x1b2   : > { %v1108_v8 = vmul.f32 0.5, %v1106_v25  ;;  %v1283_v58 = vmul.f32 %v2447_v55, %v1101_v11  ;;  %v1216_v37 = vmul.f32 0.25, %v1214_v38  ;;  %v2561_v21 = vmul.f32 %v2453_v19, %v1114_v20 }
 0x1b3   : > { %v1293_v3 = vmul.f32 %v2447_v55, %v1125_v36  ;;  %v1103_v6 = vsel %vm2813_vm14, %v1100_v29, %v1102_v30  ;;  %v2565_v17 = vmul.f32 0.5, %v1130_v26  ;;  %v1116_v13 = vsel %vm1068_vm10, %v1113_v10, %v1115_v22 }
 0x1b4   : > { %v1107_v18 = vmul.f32 %v2458_v41, %v1103_v6  ;;  %v1127_v44 = vsel %vm1082_vm0, %v1124_v50, %v1126_v7  ;;  %v1226_v60 = vmul.f32 0.25, %v1224_v35  ;;  %v2570_v1 = vmul.f32 0.5, %v1283_v58 }
 0x1b5   : > { %v1131_v16 = vmul.f32 %v2458_v41, %v1127_v44  ;;  %v1215_v19 = vmul.f32 %v2464_v24, %v1103_v6  ;;  %v2574_v57 = vmul.f32 0.5, %v1293_v3  ;;  %v2579_v27 = vmul.f32 %v2474_v46, %v1116_v13 }
 0x1b6   : > { %v2576_v55 = vmul.f32 0.5, %v1107_v18  ;;  %v1225_v15 = vmul.f32 %v2464_v24, %v1127_v44  ;;  %v1221_v29 = vmul.f32 %v2480_v51, %v1116_v13  ;;  %v1284_v41 = vmul.f32 %v2469_v40, %v1103_v6 }
 0x1b7   : > { %v2584_v0 = vmul.f32 0.5, %v1131_v16  ;;  %v1217_v43 = vmul.f32 0.25, %v1215_v19  ;;  %v2591_v10 = vmul.f32 %v2485_v14, %v1116_v13  ;;  %v1294_v50 = vmul.f32 %v2469_v40, %v1127_v44 }
 0x1b8   : > { %v2588_v63 = vmul.f32 0.25, %v1225_v15  ;;  %v1139_v46 = vrot.slane %v1044_v48, 4  ;;  %v1152_v11 = vrot.slane %v1044_v48, 5  ;;  %v1165_v30 = vrot.slane %v1044_v48, 6 }
 0x1b9   : > { %v1076_v24 = vmul.f32 %v2493_v5, %v2527_v52  ;;  %v1140_v22 = vrot.slane %v2582_v33, 4  ;;  %v1153_v7 = vrot.slane %v2582_v33, 5  ;;  %v2760_v51 = vrot.slane %v2582_v33, 6 }
 0x1ba   : > { %v1208_v25 = vmul.f32 %v2488_v9, %v2527_v52  ;;  %v1271_v14 = vmul.f32 %v2496_v34, %v2527_v52  ;;  %v1077_v36 = vmul.f32 %v2507_v23, %v2532_v47  ;;  %v1209_v38 = vmul.f32 %v2502_v49, %v2532_v47 }
 0x1bb   : > { %v1078_v20 = vmul.f32 0.5, %v1076_v24  ;;  %v1141_v40 = vsel %vm2814_vm11, %v1139_v46, %v1140_v22  ;;  %v1154_v35 = vsel %vm1068_vm10, %v1152_v11, %v1153_v7  ;;  %v1167_v58 = vsel %vm1082_vm0, %v1165_v30, %v2760_v51 }
 0x1bc   : > { %v1146_v26 = vmul.f32 %v2404_v39, %v1141_v40  ;;  %v1210_v3 = vmul.f32 0.25, %v1208_v25  ;;  %v1159_v6 = vmul.f32 %v2493_v5, %v1154_v35  ;;  %v1172_v18 = vmul.f32 %v2404_v39, %v1167_v58 }
 0x1bd   : > { %v1080_v52 = vadd.f32 %v1078_v20, %v2524_v2  ;;  %v1230_v13 = vmul.f32 %v2488_v9, %v1154_v35  ;;  %v1286_v44 = vmul.f32 0.5, %v1284_v41  ;;  %v1273_v19 = vmul.f32 0.5, %v1271_v14  ;;  %v1048_v41 = vpop.permute.xlu0 %1047 }
 0x1be   : > { %v1218_v16 = vadd.f32 %v1216_v37, %v1210_v3  ;;  %v1299_v48 = vmul.f32 %v2407_v4, %v1141_v40  ;;  %v2618_v15 = vmul.f32 0.5, %v1294_v50  ;;  %v1148_v11 = vmul.f32 0.25, %v1146_v26 }
 0x1bf   : > { %v1094_v46 = vadd.f32 %v2529_v45, %v1080_v52  ;;  %v1161_v30 = vmul.f32 0.5, %v1159_v6  ;;  %v1174_v24 = vmul.f32 0.25, %v1172_v18  ;;  %v1232_v2 = vmul.f32 0.25, %v1230_v13 }
 0x1c0   : > { %v1222_v25 = vadd.f32 %v1220_v28, %v1218_v16  ;;  %v1275_v5 = vadd.f32 %v1273_v19, %v2534_v53  ;;  %v1301_v39 = vmul.f32 0.25, %v1299_v48  ;;  %v1079_v51 = vmul.f32 0.5, %v1077_v36 }
 0x1c1   : > { %v1110_v20 = vadd.f32 %v1108_v8, %v1094_v46  ;;  %v1211_v9 = vmul.f32 0.25, %v1209_v38  ;;  %v1305_v50 = vmul.f32 %v2496_v34, %v1154_v35  ;;  %v1272_v45 = vmul.f32 %v2522_v61, %v2532_v47 }
 0x1c2   : > { %v1228_v37 = vadd.f32 %v1226_v60, %v1222_v25  ;;  %v1281_v14 = vadd.f32 %v2536_v59, %v1275_v5  ;;  %v1311_v28 = vmul.f32 %v2407_v4, %v1167_v58  ;;  %v1081_v26 = vadd.f32 %v1079_v51, %v2540_v62 }
 0x1c3   : > { %v1121_v40 = vadd.f32 %v2556_v12, %v1110_v20  ;;  %v1219_v53 = vadd.f32 %v1217_v43, %v1211_v9  ;;  %v1274_v38 = vmul.f32 0.5, %v1272_v45  ;;  %v1142_v3 = vrot.slane %v1048_v41, 4 }
 0x1c4   : > { %v1234_v8 = vadd.f32 %v1232_v2, %v1228_v37  ;;  %v1287_v36 = vadd.f32 %v2570_v1, %v1281_v14  ;;  %v1095_v59 = vadd.f32 %v2549_v42, %v1081_v26  ;;  %v1155_v35 = vrot.slane %v1048_v41, 5 }
 0x1c5   : > { %v1134_v60 = vadd.f32 %v2565_v17, %v1121_v40  ;;  %v1223_v34 = vadd.f32 %v1221_v29, %v1219_v53  ;;  %v1276_v12 = vadd.f32 %v1274_v38, %v2542_v31  ;;  %v1143_v4 = vsel %vm2815_vm12, %v1140_v22, %v1142_v3 }
 0x1c6   : > { %v1236_v52 = vmax.f32 %v1234_v8, 0.0  ;;  %v1291_v47 = vadd.f32 %v2561_v21, %v1287_v36  ;;  %v1111_v43 = vadd.f32 %v2576_v55, %v1095_v59  ;;  %v1147_v51 = vmul.f32 %v2415_v32, %v1143_v4 }
 0x1c7   : > { %v1150_v62 = vadd.f32 %v1148_v11, %v1134_v60  ;;  %v1229_v1 = vadd.f32 %v2588_v63, %v1223_v34  ;;  %v1282_v17 = vadd.f32 %v2551_v54, %v1276_v12  ;;  %v1156_v29 = vsel %vm1068_vm10, %v1153_v7, %v1155_v35 }
 0x1c8   : > { %v2638_v58 = vmin.f32 %v1236_v52, 1.0  ;;  %v1297_v42 = vadd.f32 %v2574_v57, %v1291_v47  ;;  %v1307_v6 = vmul.f32 0.5, %v1305_v50  ;;  %v1122_v31 = vadd.f32 %v2579_v27, %v1111_v43 }
 0x1c9   : > { %v1163_v21 = vadd.f32 %v1161_v30, %v1150_v62  ;;  %v1160_v22 = vmul.f32 %v2507_v23, %v1156_v29  ;;  %v1313_v63 = vmul.f32 0.25, %v1311_v28  ;;  %v1149_v13 = vmul.f32 0.25, %v1147_v51 }
 0x1ca   : > { %v1242_v55 = vmax.f32 %v2638_v58, 1e-08  ;;  %v1303_v18 = vadd.f32 %v1301_v39, %v1297_v42  ;;  %v1135_v19 = vadd.f32 %v2584_v0, %v1122_v31  ;;  %v1288_v48 = vadd.f32 %v1286_v44, %v1282_v17 }
 0x1cb   : > { %v1176_v16 = vadd.f32 %v1174_v24, %v1163_v21  ;;  %v1162_v57 = vmul.f32 0.5, %v1160_v22  ;;  %v1168_v46 = vrot.slane %v1048_v41, 6  ;;  %v1231_v7 = vmul.f32 %v2502_v49, %v1156_v29 }
 0x1cc   : > { %1594 = vlog2.f32 %v1242_v55  ;;  %v1309_v54 = vadd.f32 %v1307_v6, %v1303_v18  ;;  %v1292_v27 = vadd.f32 %v2591_v10, %v1288_v48  ;;  %v1151_v30 = vadd.f32 %v1149_v13, %v1135_v19 }
 0x1cd   : > { %v1178_v11 = vmax.f32 %v1176_v16, 0.0  ;;  %v1300_v23 = vmul.f32 %v2420_v56, %v1143_v4  ;;  %v2816_v2 = vrot.slane %v2582_v33, 6  ;;  %v1233_v5 = vmul.f32 0.25, %v1231_v7 }
 0x1ce   : > { %v1315_v25 = vadd.f32 %v1313_v63, %v1309_v54  ;;  %v1306_v0 = vmul.f32 %v2522_v61, %v1156_v29  ;;  %v1298_v20 = vadd.f32 %v2618_v15, %v1292_v27  ;;  %v1164_v39 = vadd.f32 %v1162_v57, %v1151_v30 }
 0x1cf   : > { %v1169_v24 = vsel %vm1082_vm0, %v2816_v2, %v1168_v46  ;;  %v2654_v44 = vmin.f32 %v1178_v11, 1.0  ;;  %v1235_v10 = vadd.f32 %v1233_v5, %v1229_v1  ;;  %v1302_v41 = vmul.f32 0.25, %v1300_v23 }
 0x1d0   : > { %v1173_v49 = vmul.f32 %v2415_v32, %v1169_v24  ;;  %v1317_v9 = vmax.f32 %v1315_v25, 0.0  ;;  %v1312_v14 = vmul.f32 %v2420_v56, %v1169_v24  ;;  %v1308_v61 = vmul.f32 0.5, %v1306_v0 }
 0x1d1   : > { %v1184_v37 = vmax.f32 %v2654_v44, 1e-08  ;;  %v1237_v45 = vmax.f32 %v1235_v10, 0.0  ;;  %v1304_v40 = vadd.f32 %v1302_v41, %v1298_v20  ;;  %vm1205_vm0 = vcmask 130048  }
 0x1d2   : > { %v2660_v33 = vmin.f32 %v1317_v9, 1.0  ;;  %v1175_v50 = vmul.f32 0.25, %v1173_v49  ;;  %v1314_v53 = vmul.f32 0.25, %v1312_v14  ;;  %v1240_v48 = vmul.f32 12.92, %v2638_v58 }
 0x1d3   : > { %1596 = vlog2.f32 %v1184_v37  ;;  %v2663_v26 = vmin.f32 %v1237_v45, 1.0  ;;  %v1310_v32 = vadd.f32 %v1308_v61, %v1304_v40  ;;  %vm1258_vm10 = vcmp.le.f32.partialorder %v2638_v58, 0.0031308 }
 0x1d4   : > { %v1323_v28 = vmax.f32 %v2660_v33, 1e-08  ;;  %v1177_v15 = vadd.f32 %v1175_v50, %v1164_v39  ;;  %v1182_v2 = vmul.f32 12.92, %v2654_v44  ;;  %vm1201_vm2 = vcmp.le.f32.partialorder %v2654_v44, 0.0031308 }
 0x1d5   : > { %v1243_v56 = vmax.f32 %v2663_v26, 1e-08  ;;  %v1316_v3 = vadd.f32 %v1314_v53, %v1310_v32  ;;  %v1321_v20 = vmul.f32 12.92, %v2660_v33  ;;  %vm1339_vm8 = vcmp.le.f32.partialorder %v2660_v33, 0.0031308 }
 0x1d6   : > { %v1595_v8 = vpop.eup %1594  ;;  %1598 = vlog2.f32 %v1323_v28  ;;  %v1179_v36 = vmax.f32 %v1177_v15, 0.0  ;;  %v1241_v44 = vmul.f32 12.92, %v2663_v26  ;;  %vm1259_vm3 = vcmp.le.f32.partialorder %v2663_v26, 0.0031308 }
 0x1d7   : > { %v1245_v38 = vmul.f32 0.6931472, %v1595_v8  ;;  %1600 = vlog2.f32 %v1243_v56  ;;  %v1318_v34 = vmax.f32 %v1316_v3, 0.0 }
 0x1d8   : > { %v2666_v60 = vmin.f32 %v1179_v36, 1.0 }
 0x1d9   : > { %v1248_v59 = vmul.f32 0.41666666, %v1245_v38  ;;  %v2669_v47 = vmin.f32 %v1318_v34, 1.0 }
 0x1da   : > { %v1185_v35 = vmax.f32 %v2666_v60, 1e-08  ;;  %v1183_v33 = vmul.f32 12.92, %v2666_v60  ;;  %vm1202_vm5 = vcmp.le.f32.partialorder %v2666_v60, 0.0031308 }
 0x1db   : > { %v1250_v52 = vmul.f32 1.442695, %v1248_v59  ;;  %v1324_v4 = vmax.f32 %v2669_v47, 1e-08  ;;  %v1322_v28 = vmul.f32 12.92, %v2669_v47 }
 0x1dc   : > { %1602 = vlog2.f32 %v1185_v35  ;;  %vm1340_vm6 = vcmp.le.f32.partialorder %v2669_v47, 0.0031308 }
 0x1dd   : > { %v1597_v12 = vpop.eup %1596  ;;  %1604 = vpow2.f32 %v1250_v52 }
 0x1de   : > { %v1187_v62 = vmul.f32 0.6931472, %v1597_v12  ;;  %1606 = vlog2.f32 %v1324_v4 }
 0x1e0   : > { %v1599_v43 = vpop.eup %1598  ;;  %v1191_v1 = vmul.f32 0.41666666, %v1187_v62 }
 0x1e1   : > { %v1326_v51 = vmul.f32 0.6931472, %v1599_v43  ;;  %v1601_v17 = vpop.eup %1600 }
 0x1e2   : > { %v1193_v42 = vmul.f32 1.442695, %v1191_v1  ;;  %v1247_v21 = vmul.f32 0.6931472, %v1601_v17 }
 0x1e3   : > { %v1329_v29 = vmul.f32 0.41666666, %v1326_v51 }
 0x1e4   : > { %1608 = vpow2.f32 %v1193_v42  ;;  %v1249_v22 = vmul.f32 0.41666666, %v1247_v21 }
 0x1e5   : > { %v1331_v6 = vmul.f32 1.442695, %v1329_v29 }
 0x1e6   : > { %v1603_v31 = vpop.eup %1602  ;;  %v1252_v13 = vmul.f32 1.442695, %v1249_v22 }
 0x1e7   : > { %v1605_v55 = vpop.eup %1604  ;;  %1610 = vpow2.f32 %v1331_v6  ;;  %v1189_v18 = vmul.f32 0.6931472, %v1603_v31 }
 0x1e8   : > { %v1254_v63 = vmul.f32 1.055, %v1605_v55  ;;  %v1607_v16 = vpop.eup %1606  ;;  %1612 = vpow2.f32 %v1252_v13 }
 0x1e9   : > { %v1192_v19 = vmul.f32 0.41666666, %v1189_v18  ;;  %v1328_v54 = vmul.f32 0.6931472, %v1607_v16 }
 0x1ea   : > { %v1482_v57 = vadd.f32 -0.055, %v1254_v63 }
 0x1eb   : > { %v1195_v46 = vmul.f32 1.442695, %v1192_v19  ;;  %v1330_v11 = vmul.f32 0.41666666, %v1328_v54 }
 0x1ec   : > { %v1260_v7 = vsel %vm1258_vm10, %v1240_v48, %v1482_v57 }
 0x1ed   : > { %1484 = vst.msk [vmem:[%s2677_s17 + $0x10] sm:$0xff] %vm1205_vm0, %v1260_v7  ;;  %1614 = vpow2.f32 %v1195_v46  ;;  %v1333_v30 = vmul.f32 1.442695, %v1330_v11 }
 0x1ee   : > { %v1609_v27 = vpop.eup %1608 }
 0x1ef   : > { %v1197_v23 = vmul.f32 1.055, %v1609_v27  ;;  %1616 = vpow2.f32 %v1333_v30 }
 0x1f1   : > { %v1611_v25 = vpop.eup %1610  ;;  %v1480_v24 = vadd.f32 -0.055, %v1197_v23 }
 0x1f2   : > { %v1335_v58 = vmul.f32 1.055, %v1611_v25  ;;  %v1613_v0 = vpop.eup %1612 }
 0x1f3   : > { %v1203_v5 = vsel %vm1201_vm2, %v1182_v2, %v1480_v24  ;;  %v1255_v49 = vmul.f32 1.055, %v1613_v0 }
 0x1f4   : > { %1206 = vst.msk [vmem:[%s2677_s17] sm:$0xff] %vm1205_vm0, %v1203_v5  ;;  %v1486_v39 = vadd.f32 -0.055, %v1335_v58 }
 0x1f5   : > { %v1483_v41 = vadd.f32 -0.055, %v1255_v49 }
 0x1f6   : > { %v1341_v9 = vsel %vm1339_vm8, %v1321_v20, %v1486_v39 }
 0x1f7   : > { %v1615_v10 = vpop.eup %1614  ;;  %1488 = vst.msk [vmem:[%s2677_s17 + $0x20] sm:$0xff] %vm1205_vm0, %v1341_v9  ;;  %v1261_v14 = vsel %vm1259_vm3, %v1241_v44, %v1483_v41 }
 0x1f8   : > { %v1198_v37 = vmul.f32 1.055, %v1615_v10  ;;  %1485 = vst.msk [vmem:[%s2677_s17 + $0x18] sm:$0xff] %vm1205_vm0, %v1261_v14 }
 0x1f9   : > { %v1617_v50 = vpop.eup %1616 }
 0x1fa   : > { %v1481_v45 = vadd.f32 -0.055, %v1198_v37  ;;  %v1336_v40 = vmul.f32 1.055, %v1617_v50 }
 0x1fc   : > { %v1204_v61 = vsel %vm1202_vm5, %v1183_v33, %v1481_v45  ;;  %v1487_v15 = vadd.f32 -0.055, %v1336_v40 }
 0x1fd   : > { %1207 = vst.msk [vmem:[%s2677_s17 + $0x8] sm:$0xff] %vm1205_vm0, %v1204_v61 }
 0x1fe   : > { %v1342_v26 = vsel %vm1340_vm6, %v1322_v28, %v1487_v15 }
 0x1ff   : > { %1489 = vst.msk [vmem:[%s2677_s17 + $0x28] sm:$0xff] %vm1205_vm0, %v1342_v26 }
 0x200   : > { %1631 = shalt.err (!%p1628_p3)
}
 0x201   : > { %s1632_s30 = scalar_lea.hbm %s2703_s24, 768  ;;  %s1636_s5 = scalar_lea.hbm %s2755_s2, 1536 }
 0x202   : > { %p1633_p4 = scmp.ne.s32.totalorder %s2703_s24, %s1632_s30  ;;  %p1637_p9 = scmp.lt.u32.totalorder %s2703_s24, %s2755_s2 }
 0x203   : > { %p1638_p10 = scmp.lt.u32.totalorder %s1636_s5, %s1632_s30  ;;  %p1640_p12 = scmp.lt.u32.totalorder %s1632_s30, %s2703_s24 }
 0x204   : > { %p1634_p7 = pnand %p1633_p4, %p1746_p5 }
 0x205   : > { %p1639_p11 = por %p1638_p10, %p1637_p9 }
 0x206   : > { %p1635_p8 = pneg %p1634_p7 }
 0x207   : > { %p1641_p13 = por %p1640_p12, %p1639_p11 }
 0x209   : > { %p1642_p0 = pnand %p1641_p13, %p1635_p8 }
 0x20b   : > { %1645 = shalt.err (!%p1642_p0)
}
 0x20c   : > { %s1691_s8 = smov 128   ;;  %s1692_s14 = smov 8  }
 0x20d   : > { %1497 = dma.vmem_to_hbm [thread:$0]  (%p1746_p5), %s2706_s22, 768, %s2703_s24, %s2712_s25, %s1691_s8, %s1691_s8, %s1692_s14  }
 0x20e PF: > { %p1503_p1 = scmp.ge.s32.totalorder %s1680_s12, 2  ;;  %s1375_s16 = sand.u32 1, %s1668_s9  }
 0x20f   : > { %s1376_s17 = scalar_lea.sflag [#allocation3], %s1375_s16 }
 0x210   : > { %p1500_p2 = pnand %p1503_p1, %p1750_p6 }
 0x212   : > { %1663 = dma.done.wait (!%p1500_p2), %s1376_s17, 768  }
 0x213   : > { %1665 = vsyncadd (!%p1500_p2), %s1376_s17, 4294966528  ;;  %p12_p3 = scmp.ge.s32.totalorder %s1733_s15, 4   ;;  %s2817_s9 = smov %s1672_s10 }
 0x214   : > { %s2818_s10 = smov %s1676_s11  ;;  %s2819_s11 = smov %s1744_s18 }
 0x215   : > { %s2820_s12 = smov %s1733_s15  ;;  %14 = sbr.rel (!%p12_p3) target bundleno = 3 (0x3), region = 70 }
 0x21c   :  { %1381 = vsyncpa [#allocation3], 1 }
 0x21d   :  { %1383 = vsyncpa [#allocation3 + $0x1], 1 }

</bundles_post_ra>
